<compile_context>
chip_gen: v5e
topology: v5e:2x2
jax: 0.10.0
libtpu: 0.0.40
codegen_flags: <defaults>
</compile_context>

<pallas_src>
import jax
import jax.numpy as jnp
from jax.experimental import pallas as pl
from jax.experimental.pallas import tpu as pltpu

N_NODES = 50          # fixed by torch.reshape(x, (50, 7*128))
IN_FEAT = 7 * 128     # 896
NHID1 = 64
NHID2 = 32
NCLASS = 16
NCLASS_PAD = 128      # lane-dense output slab width
BATCH = 2
DROPOUT = 0.5         # no-op in eval mode


def gcn_kernel(x_ref, adj_ref,
               w1_ref, b1_ref,
               w2_ref, b2_ref,
               w3p_ref, cp_ref, wdt_ref,
               out_ref):
    """Single invocation processes the whole (small) batch; everything resident in VMEM."""
    B = x_ref.shape[0]

    # Hoist weight loads out of the (static, unrolled) batch loop.
    w1 = w1_ref[...]          # (IN_FEAT, NHID1)
    b1 = b1_ref[...]          # (1, NHID1)
    w2 = w2_ref[...]          # (NHID1, NHID2)
    b2 = b2_ref[...]          # (1, NHID2)
    w3p = w3p_ref[...]        # (NHID2, NCLASS_PAD)  zero-padded columns
    cp = cp_ref[...]          # (1, NCLASS_PAD)      = sum(wd)*b3 + bd (padded)
    wdt = wdt_ref[...]        # (N_NODES, 1)         = wd.T

    for b in range(B):        # B == 2: tiny static unroll, one kernel step total
        x = x_ref[b]          # (N_NODES, IN_FEAT)
        a = adj_ref[b]        # (N_NODES, N_NODES)

        # --- gc1: relu(A @ (X @ W1) + b1) ---
        h = jnp.dot(x, w1, preferred_element_type=jnp.float32)
        h = jnp.maximum(jnp.dot(a, h, preferred_element_type=jnp.float32) + b1, 0.0)

        # --- gc2: relu(A @ (h1 @ W2) + b2) ---
        h = jnp.dot(h, w2, preferred_element_type=jnp.float32)
        h = jnp.maximum(jnp.dot(a, h, preferred_element_type=jnp.float32) + b2, 0.0)

        # dropout(p, training=False) -> identity

        # --- gc3 + dense head:
        #     y = wd @ (A @ (h2 @ W3) + b3) + bd
        #       = wd @ (A @ (h2 @ W3)) + (sum(wd) * b3 + bd)
        # The two (50, .) matmuls stay on the MXU; the M=1 contraction over nodes is
        # done as a VPU broadcast-multiply + cross-sublane reduction (no M=1 MXU push).
        t = jnp.dot(h, w3p, preferred_element_type=jnp.float32)   # (N_NODES, NCLASS_PAD)
        t = jnp.dot(a, t, preferred_element_type=jnp.float32)     # (N_NODES, NCLASS_PAD)
        y = jnp.sum(wdt * t, axis=0, keepdims=True) + cp          # (1, NCLASS_PAD)

        out_ref[b] = y        # lane-dense (1, NCLASS_PAD) store


@jax.jit
def gcn_forward(x_embed, adj, params):
    """x_embed: (B, 50, 7, 128) float32, adj: (B, 50, 50) float32 -> (nclass, B)."""
    B = x_embed.shape[0]
    w1, b1, w2, b2, w3, b3, wd, bd = params

    # glue reshape (torch.reshape(x, (50, 896))); no node-axis padding anywhere
    x = x_embed.reshape(B, N_NODES, IN_FEAT)

    # lane-dense head: pad W3 columns and the folded constant term to NCLASS_PAD
    w3p = jnp.pad(w3, ((0, 0), (0, NCLASS_PAD - NCLASS)))
    c = jnp.sum(wd) * b3 + bd                                   # (1, NCLASS)
    cp = jnp.pad(c, ((0, 0), (0, NCLASS_PAD - NCLASS)))         # (1, NCLASS_PAD)
    wdt = wd.T                                                  # (N_NODES, 1)

    vmem = pl.BlockSpec(memory_space=pltpu.MemorySpace.VMEM)    # whole array resident

    flops = 2 * B * (N_NODES * IN_FEAT * NHID1        # X @ W1
                     + N_NODES * N_NODES * NHID1      # A @ (X W1)
                     + N_NODES * NHID1 * NHID2        # h1 @ W2
                     + N_NODES * N_NODES * NHID2      # A @ (h1 W2)
                     + N_NODES * NHID2 * NCLASS_PAD   # h2 @ W3
                     + N_NODES * N_NODES * NCLASS_PAD # A @ (h2 W3)
                     + N_NODES * NCLASS_PAD)          # wd-reduction
    bytes_accessed = 4 * (x.size + adj.size + w1.size + b1.size + w2.size + b2.size
                          + w3p.size + cp.size + wdt.size + B * NCLASS_PAD)

    out = pl.pallas_call(
        gcn_kernel,
        out_shape=jax.ShapeDtypeStruct((B, 1, NCLASS_PAD), jnp.float32),
        in_specs=[vmem] * 9,
        out_specs=vmem,
        cost_estimate=pl.CostEstimate(flops=flops, transcendentals=0,
                                      bytes_accessed=bytes_accessed),
    )(x, adj, w1, b1, w2, b2, w3p, cp, wdt)

    # stack + transpose(0, 1) -> (nclass, B); drop lane padding
    return out.reshape(B, NCLASS_PAD)[:, :NCLASS].T


def init_params(key):
    ks = jax.random.split(key, 8)
    scale = 0.1
    w1 = scale * jax.random.normal(ks[0], (IN_FEAT, NHID1), jnp.float32)
    b1 = scale * jax.random.normal(ks[1], (1, NHID1), jnp.float32)
    w2 = scale * jax.random.normal(ks[2], (NHID1, NHID2), jnp.float32)
    b2 = scale * jax.random.normal(ks[3], (1, NHID2), jnp.float32)
    w3 = scale * jax.random.normal(ks[4], (NHID2, NCLASS), jnp.float32)
    b3 = scale * jax.random.normal(ks[5], (1, NCLASS), jnp.float32)
    wd = scale * jax.random.normal(ks[6], (1, N_NODES), jnp.float32)   # nn.Linear(node_size, 1)
    bd = scale * jax.random.normal(ks[7], (1, 1), jnp.float32)
    return (w1, b1, w2, b2, w3, b3, wd, bd)


def gcn_reference(x_embed, adj, params):
    """Pure-JAX reference matching the PyTorch forward (unfolded, unpadded)."""
    w1, b1, w2, b2, w3, b3, wd, bd = params
    B = x_embed.shape[0]
    outs = []
    for b in range(B):
        feat = x_embed[b].reshape(N_NODES, IN_FEAT)
        a = adj[b]
        h = jnp.maximum(a @ (feat @ w1) + b1, 0.0)
        h = jnp.maximum(a @ (h @ w2) + b2, 0.0)
        h = a @ (h @ w3) + b3                       # (50, nclass)
        y = (wd @ h + bd).reshape(NCLASS)           # dense over node axis, squeeze
        outs.append(y)
    return jnp.stack(outs).T                        # (nclass, B)


if __name__ == "__main__":
    key = jax.random.PRNGKey(0)
    k_x, k_adj, k_p = jax.random.split(key, 3)

    # X: outputs of node_embedd for each sample -> (B, 50, 7, 128)
    x_embed = jax.random.normal(k_x, (BATCH, N_NODES, 7, 128), jnp.float32)
    adj = jax.random.normal(k_adj, (BATCH, N_NODES, N_NODES), jnp.float32)
    params = init_params(k_p)

    out = gcn_forward(x_embed, adj, params)
    out = jax.block_until_ready(out)

    ref = gcn_reference(x_embed, adj, params)
    assert out.shape == (NCLASS, BATCH), out.shape
    assert jnp.allclose(out, ref, atol=1e-3, rtol=1e-3), "mismatch vs reference"

    print("KERNEL_OK")
</pallas_src>

<mosaic_0001>
module attributes {stable_mosaic.version = 11 : i64} {
  func.func @gcn_kernel(%arg0: memref<2x50x896xf32, #tpu.memory_space<vmem>>, %arg1: memref<2x50x50xf32, #tpu.memory_space<vmem>>, %arg2: memref<896x64xf32, #tpu.memory_space<vmem>>, %arg3: memref<1x64xf32, #tpu.memory_space<vmem>>, %arg4: memref<64x32xf32, #tpu.memory_space<vmem>>, %arg5: memref<1x32xf32, #tpu.memory_space<vmem>>, %arg6: memref<32x128xf32, #tpu.memory_space<vmem>>, %arg7: memref<1x128xf32, #tpu.memory_space<vmem>>, %arg8: memref<50x1xf32, #tpu.memory_space<vmem>>, %arg9: memref<2x1x128xf32, #tpu.memory_space<vmem>>) attributes {dimension_semantics = [], scalar_prefetch = 0 : i64, scratch_operands = 0 : i64, tpu.core_type = #tpu.core_type<tc>} {
    %c0 = arith.constant 0 : index
    %c0_0 = arith.constant 0 : index
    %0 = vector.load %arg2[%c0, %c0_0] : memref<896x64xf32, #tpu.memory_space<vmem>>, vector<896x64xf32>
    %c0_1 = arith.constant 0 : index
    %c0_2 = arith.constant 0 : index
    %1 = vector.load %arg3[%c0_1, %c0_2] : memref<1x64xf32, #tpu.memory_space<vmem>>, vector<1x64xf32>
    %c0_3 = arith.constant 0 : index
    %c0_4 = arith.constant 0 : index
    %2 = vector.load %arg4[%c0_3, %c0_4] : memref<64x32xf32, #tpu.memory_space<vmem>>, vector<64x32xf32>
    %c0_5 = arith.constant 0 : index
    %c0_6 = arith.constant 0 : index
    %3 = vector.load %arg5[%c0_5, %c0_6] : memref<1x32xf32, #tpu.memory_space<vmem>>, vector<1x32xf32>
    %c0_7 = arith.constant 0 : index
    %c0_8 = arith.constant 0 : index
    %4 = vector.load %arg6[%c0_7, %c0_8] : memref<32x128xf32, #tpu.memory_space<vmem>>, vector<32x128xf32>
    %c0_9 = arith.constant 0 : index
    %c0_10 = arith.constant 0 : index
    %5 = vector.load %arg7[%c0_9, %c0_10] : memref<1x128xf32, #tpu.memory_space<vmem>>, vector<1x128xf32>
    %c0_11 = arith.constant 0 : index
    %c0_12 = arith.constant 0 : index
    %6 = vector.load %arg8[%c0_11, %c0_12] : memref<50x1xf32, #tpu.memory_space<vmem>>, vector<50x1xf32>
    %c0_13 = arith.constant 0 : index
    %c0_14 = arith.constant 0 : index
    %c0_15 = arith.constant 0 : index
    %7 = vector.load %arg0[%c0_13, %c0_14, %c0_15] : memref<2x50x896xf32, #tpu.memory_space<vmem>>, vector<1x50x896xf32>
    %8 = vector.shape_cast %7 : vector<1x50x896xf32> to vector<50x896xf32>
    %c0_16 = arith.constant 0 : index
    %c0_17 = arith.constant 0 : index
    %c0_18 = arith.constant 0 : index
    %9 = vector.load %arg1[%c0_16, %c0_17, %c0_18] : memref<2x50x50xf32, #tpu.memory_space<vmem>>, vector<1x50x50xf32>
    %10 = vector.shape_cast %9 : vector<1x50x50xf32> to vector<50x50xf32>
    %cst = arith.constant dense<0.000000e+00> : vector<50x64xf32>
    %11 = tpu.matmul %8, %0, %cst {dimension_numbers = #tpu.dot_dimension_numbers<[1], [0], [0], [1], [0, 0, 1, 1], [], []>} : vector<50x896xf32>, vector<896x64xf32>, vector<50x64xf32> -> vector<50x64xf32>
    %cst_19 = arith.constant dense<0.000000e+00> : vector<50x64xf32>
    %12 = tpu.matmul %10, %11, %cst_19 {dimension_numbers = #tpu.dot_dimension_numbers<[1], [0], [0], [1], [0, 0, 1, 1], [], []>} : vector<50x50xf32>, vector<50x64xf32>, vector<50x64xf32> -> vector<50x64xf32>
    %13 = vector.broadcast %1 : vector<1x64xf32> to vector<50x64xf32>
    %14 = arith.addf %12, %13 : vector<50x64xf32>
    %cst_20 = arith.constant 0.000000e+00 : f32
    %15 = vector.broadcast %cst_20 : f32 to vector<50x64xf32>
    %16 = arith.maximumf %14, %15 : vector<50x64xf32>
    %cst_21 = arith.constant dense<0.000000e+00> : vector<50x32xf32>
    %17 = tpu.matmul %16, %2, %cst_21 {dimension_numbers = #tpu.dot_dimension_numbers<[1], [0], [0], [1], [0, 0, 1, 1], [], []>} : vector<50x64xf32>, vector<64x32xf32>, vector<50x32xf32> -> vector<50x32xf32>
    %cst_22 = arith.constant dense<0.000000e+00> : vector<50x32xf32>
    %18 = tpu.matmul %10, %17, %cst_22 {dimension_numbers = #tpu.dot_dimension_numbers<[1], [0], [0], [1], [0, 0, 1, 1], [], []>} : vector<50x50xf32>, vector<50x32xf32>, vector<50x32xf32> -> vector<50x32xf32>
    %19 = vector.broadcast %3 : vector<1x32xf32> to vector<50x32xf32>
    %20 = arith.addf %18, %19 : vector<50x32xf32>
    %cst_23 = arith.constant 0.000000e+00 : f32
    %21 = vector.broadcast %cst_23 : f32 to vector<50x32xf32>
    %22 = arith.maximumf %20, %21 : vector<50x32xf32>
    %cst_24 = arith.constant dense<0.000000e+00> : vector<50x128xf32>
    %23 = tpu.matmul %22, %4, %cst_24 {dimension_numbers = #tpu.dot_dimension_numbers<[1], [0], [0], [1], [0, 0, 1, 1], [], []>} : vector<50x32xf32>, vector<32x128xf32>, vector<50x128xf32> -> vector<50x128xf32>
    %cst_25 = arith.constant dense<0.000000e+00> : vector<50x128xf32>
    %24 = tpu.matmul %10, %23, %cst_25 {dimension_numbers = #tpu.dot_dimension_numbers<[1], [0], [0], [1], [0, 0, 1, 1], [], []>} : vector<50x50xf32>, vector<50x128xf32>, vector<50x128xf32> -> vector<50x128xf32>
    %25 = vector.broadcast %6 : vector<50x1xf32> to vector<50x128xf32>
    %26 = arith.mulf %25, %24 : vector<50x128xf32>
    %cst_26 = arith.constant dense<0.000000e+00> : vector<128xf32>
    %27 = vector.multi_reduction <add>, %26, %cst_26 [0] : vector<50x128xf32> to vector<128xf32>
    %28 = vector.shape_cast %27 : vector<128xf32> to vector<1x128xf32>
    %29 = arith.addf %28, %5 : vector<1x128xf32>
    %c0_27 = arith.constant 0 : index
    %c0_28 = arith.constant 0 : index
    %c0_29 = arith.constant 0 : index
    %30 = vector.load %arg9[%c0_27, %c0_28, %c0_29] : memref<2x1x128xf32, #tpu.memory_space<vmem>>, vector<1x1x128xf32>
    %31 = vector.shape_cast %30 : vector<1x1x128xf32> to vector<1x128xf32>
    %32 = vector.shape_cast %29 : vector<1x128xf32> to vector<1x1x128xf32>
    tpu.vector_store %arg9[%c0_27, %c0_28, %c0_29], %32 {strides = array<i32>} : memref<2x1x128xf32, #tpu.memory_space<vmem>>, vector<1x1x128xf32>,
    %c1 = arith.constant 1 : index
    %c0_30 = arith.constant 0 : index
    %c0_31 = arith.constant 0 : index
    %33 = vector.load %arg0[%c1, %c0_30, %c0_31] : memref<2x50x896xf32, #tpu.memory_space<vmem>>, vector<1x50x896xf32>
    %34 = vector.shape_cast %33 : vector<1x50x896xf32> to vector<50x896xf32>
    %c1_32 = arith.constant 1 : index
    %c0_33 = arith.constant 0 : index
    %c0_34 = arith.constant 0 : index
    %35 = vector.load %arg1[%c1_32, %c0_33, %c0_34] : memref<2x50x50xf32, #tpu.memory_space<vmem>>, vector<1x50x50xf32>
    %36 = vector.shape_cast %35 : vector<1x50x50xf32> to vector<50x50xf32>
    %cst_35 = arith.constant dense<0.000000e+00> : vector<50x64xf32>
    %37 = tpu.matmul %34, %0, %cst_35 {dimension_numbers = #tpu.dot_dimension_numbers<[1], [0], [0], [1], [0, 0, 1, 1], [], []>} : vector<50x896xf32>, vector<896x64xf32>, vector<50x64xf32> -> vector<50x64xf32>
    %cst_36 = arith.constant dense<0.000000e+00> : vector<50x64xf32>
    %38 = tpu.matmul %36, %37, %cst_36 {dimension_numbers = #tpu.dot_dimension_numbers<[1], [0], [0], [1], [0, 0, 1, 1], [], []>} : vector<50x50xf32>, vector<50x64xf32>, vector<50x64xf32> -> vector<50x64xf32>
    %39 = vector.broadcast %1 : vector<1x64xf32> to vector<50x64xf32>
    %40 = arith.addf %38, %39 : vector<50x64xf32>
    %cst_37 = arith.constant 0.000000e+00 : f32
    %41 = vector.broadcast %cst_37 : f32 to vector<50x64xf32>
    %42 = arith.maximumf %40, %41 : vector<50x64xf32>
    %cst_38 = arith.constant dense<0.000000e+00> : vector<50x32xf32>
    %43 = tpu.matmul %42, %2, %cst_38 {dimension_numbers = #tpu.dot_dimension_numbers<[1], [0], [0], [1], [0, 0, 1, 1], [], []>} : vector<50x64xf32>, vector<64x32xf32>, vector<50x32xf32> -> vector<50x32xf32>
    %cst_39 = arith.constant dense<0.000000e+00> : vector<50x32xf32>
    %44 = tpu.matmul %36, %43, %cst_39 {dimension_numbers = #tpu.dot_dimension_numbers<[1], [0], [0], [1], [0, 0, 1, 1], [], []>} : vector<50x50xf32>, vector<50x32xf32>, vector<50x32xf32> -> vector<50x32xf32>
    %45 = vector.broadcast %3 : vector<1x32xf32> to vector<50x32xf32>
    %46 = arith.addf %44, %45 : vector<50x32xf32>
    %cst_40 = arith.constant 0.000000e+00 : f32
    %47 = vector.broadcast %cst_40 : f32 to vector<50x32xf32>
    %48 = arith.maximumf %46, %47 : vector<50x32xf32>
    %cst_41 = arith.constant dense<0.000000e+00> : vector<50x128xf32>
    %49 = tpu.matmul %48, %4, %cst_41 {dimension_numbers = #tpu.dot_dimension_numbers<[1], [0], [0], [1], [0, 0, 1, 1], [], []>} : vector<50x32xf32>, vector<32x128xf32>, vector<50x128xf32> -> vector<50x128xf32>
    %cst_42 = arith.constant dense<0.000000e+00> : vector<50x128xf32>
    %50 = tpu.matmul %36, %49, %cst_42 {dimension_numbers = #tpu.dot_dimension_numbers<[1], [0], [0], [1], [0, 0, 1, 1], [], []>} : vector<50x50xf32>, vector<50x128xf32>, vector<50x128xf32> -> vector<50x128xf32>
    %51 = vector.broadcast %6 : vector<50x1xf32> to vector<50x128xf32>
    %52 = arith.mulf %51, %50 : vector<50x128xf32>
    %cst_43 = arith.constant dense<0.000000e+00> : vector<128xf32>
    %53 = vector.multi_reduction <add>, %52, %cst_43 [0] : vector<50x128xf32> to vector<128xf32>
    %54 = vector.shape_cast %53 : vector<128xf32> to vector<1x128xf32>
    %55 = arith.addf %54, %5 : vector<1x128xf32>
    %c1_44 = arith.constant 1 : index
    %c0_45 = arith.constant 0 : index
    %c0_46 = arith.constant 0 : index
    %56 = vector.load %arg9[%c1_44, %c0_45, %c0_46] : memref<2x1x128xf32, #tpu.memory_space<vmem>>, vector<1x1x128xf32>
    %57 = vector.shape_cast %56 : vector<1x1x128xf32> to vector<1x128xf32>
    %58 = vector.shape_cast %55 : vector<1x128xf32> to vector<1x1x128xf32>
    tpu.vector_store %arg9[%c1_44, %c0_45, %c0_46], %58 {strides = array<i32>} : memref<2x1x128xf32, #tpu.memory_space<vmem>>, vector<1x1x128xf32>,
    return
  }
}

</mosaic_0001>

<bundles_post_ra>
// kernel: gcn_forward.1
= control target key start
LH: loop header
LB: loop body
LE: loop exit
PB: predicated region body
PF: predicated region fallthrough
CT: control target
= control target key end

     0   :  { %vm513_vm0 = vcmask 1041408   ;;  %vm491_vm1 = vcmask 408576   ;;  %vm562_vm2 = vcmask 523264   ;;  %vm673_vm3 = vcmask 261120   ;;  %s3153_s2 = inlined_call_operand.vmem [shape: f32[896,64], index: 2, kind: input, shape index: {}]   ;;  %s3154_s0 = inlined_call_operand.vmem [shape: f32[2,50,896], index: 0, kind: input, shape index: {}]   ;;  %s3155_s3 = inlined_call_operand.vmem [shape: f32[1,64], index: 3, kind: input, shape index: {}]   ;;  %s3156_s1 = inlined_call_operand.vmem [shape: f32[2,50,50], index: 1, kind: input, shape index: {}]   ;;  %s3157_s4 = inlined_call_operand.vmem [shape: f32[64,32], index: 4, kind: input, shape index: {}]   ;;  %s3158_s5 = inlined_call_operand.vmem [shape: f32[1,32], index: 5, kind: input, shape index: {}]   ;;  %s3159_s6 = inlined_call_operand.vmem [shape: f32[32,128], index: 6, kind: input, shape index: {}]   ;;  %s3160_s8 = inlined_call_operand.vmem [shape: f32[50,1], index: 8, kind: input, shape index: {}]   ;;  %s3161_s7 = inlined_call_operand.vmem [shape: f32[1,128], index: 7, kind: input, shape index: {}]   ;;  %s3162_s9 = inlined_call_operand.vmem [shape: f32[2,1,128], index: 9, kind: output, shape index: {}]  }
   0x1   :  { %v1683_v0 = vld [vmem:[%s3153_s2 + $0x78] sm:$0xff]  ;;  %v1691_v2 = vld [vmem:[%s3153_s2 + $0x70] sm:$0xff]  ;;  %v1706_v6 = vld [vmem:[%s3153_s2 + $0x68] sm:$0xff] }
   0x2   :  { %v79_v1 = vld [vmem:[%s3153_s2 + $0x178] sm:$0xff]  ;;  %3243 = vst [vmem:[#allocation2_spill] sm:$0xff] %v1691_v2  ;;  %222 = vmatpush.msra.mxu0 %v1683_v0  ;;  %v78_v4 = vld [vmem:[%s3153_s2 + $0x170] sm:$0xff]  ;;  %v77_v8 = vld [vmem:[%s3153_s2 + $0x168] sm:$0xff] }
   0x3   :  { %298 = vmatpush.msra.mxu2 %v79_v1  ;;  %v63_v3 = vld [vmem:[%s3153_s2 + $0xf8] sm:$0xff]  ;;  %3244 = vst [vmem:[#allocation3_spill] sm:$0xff] %v1706_v6  ;;  %v62_v7 = vld [vmem:[%s3153_s2 + $0xf0] sm:$0xff]  ;;  %v61_v10 = vld [vmem:[%s3153_s2 + $0xe8] sm:$0xff] }
   0x4   :  { %v95_v5 = vld [vmem:[%s3153_s2 + $0x1f8] sm:$0xff]  ;;  %260 = vmatpush.msra.mxu1 %v63_v3  ;;  %223 = vmatpush.msra.mxu0 %v1691_v2  ;;  %v94_v9 = vld [vmem:[%s3153_s2 + $0x1f0] sm:$0xff]  ;;  %v1724_v11 = vld [vmem:[%s3153_s2 + $0x60] sm:$0xff] }
   0x5   :  { %336 = vmatpush.msra.mxu3 %v95_v5  ;;  %299 = vmatpush.msra.mxu2 %v78_v4  ;;  %3245 = vst [vmem:[#allocation4_spill] sm:$0xff] %v1724_v11  ;;  %v76_v12 = vld [vmem:[%s3153_s2 + $0x160] sm:$0xff]  ;;  %v93_v13 = vld [vmem:[%s3153_s2 + $0x1e8] sm:$0xff]  ;;  %v1742_v16 = vld [vmem:[%s3153_s2 + $0x58] sm:$0xff] }
   0x6   :  { %261 = vmatpush.msra.mxu1 %v62_v7  ;;  %224 = vmatpush.msra.mxu0 %v1706_v6  ;;  %v60_v14 = vld [vmem:[%s3153_s2 + $0xe0] sm:$0xff]  ;;  %3246 = vst [vmem:[#allocation5_spill] sm:$0xff] %v1742_v16  ;;  %v75_v17 = vld [vmem:[%s3153_s2 + $0x158] sm:$0xff]  ;;  %v1759_v20 = vld [vmem:[%s3153_s2 + $0x50] sm:$0xff] }
   0x7   :  { %337 = vmatpush.msra.mxu3 %v94_v9  ;;  %300 = vmatpush.msra.mxu2 %v77_v8  ;;  %v92_v15 = vld [vmem:[%s3153_s2 + $0x1e0] sm:$0xff]  ;;  %v1751_v18 = vld [vmem:[%s3153_s2 + $0xd8] sm:$0xff]  ;;  %3248 = vst [vmem:[#allocation7_spill] sm:$0xff] %v1759_v20  ;;  %v74_v21 = vld [vmem:[%s3153_s2 + $0x150] sm:$0xff] }
   0x8   :  { %262 = vmatpush.msra.mxu1 %v61_v10  ;;  %225 = vmatpush.msra.mxu0 %v1724_v11  ;;  %3247 = vst [vmem:[#allocation6_spill] sm:$0xff] %v1751_v18  ;;  %v91_v19 = vld [vmem:[%s3153_s2 + $0x1d8] sm:$0xff]  ;;  %v1768_v22 = vld [vmem:[%s3153_s2 + $0xd0] sm:$0xff]  ;;  %v1777_v24 = vld [vmem:[%s3153_s2 + $0x48] sm:$0xff] }
   0x9   :  { %338 = vmatpush.msra.mxu3 %v93_v13  ;;  %301 = vmatpush.msra.mxu2 %v76_v12  ;;  %3249 = vst [vmem:[#allocation8_spill] sm:$0xff] %v1768_v22  ;;  %v90_v23 = vld [vmem:[%s3153_s2 + $0x1d0] sm:$0xff]  ;;  %v73_v25 = vld [vmem:[%s3153_s2 + $0x148] sm:$0xff]  ;;  %v1795_v28 = vld [vmem:[%s3153_s2 + $0x40] sm:$0xff] }
   0xa   :  { %263 = vmatpush.msra.mxu1 %v60_v14  ;;  %226 = vmatpush.msra.mxu0 %v1742_v16  ;;  %3250 = vst [vmem:[#allocation9_spill] sm:$0xff] %v1777_v24  ;;  %v1786_v26 = vld [vmem:[%s3153_s2 + $0xc8] sm:$0xff]  ;;  %v72_v29 = vld [vmem:[%s3153_s2 + $0x140] sm:$0xff]  ;;  %v1813_v32 = vld [vmem:[%s3153_s2 + $0x38] sm:$0xff] }
   0xb   :  { %339 = vmatpush.msra.mxu3 %v92_v15  ;;  %302 = vmatpush.msra.mxu2 %v75_v17  ;;  %3251 = vst [vmem:[#allocation10_spill] sm:$0xff] %v1786_v26  ;;  %v89_v27 = vld [vmem:[%s3153_s2 + $0x1c8] sm:$0xff]  ;;  %v1804_v30 = vld [vmem:[%s3153_s2 + $0xc0] sm:$0xff]  ;;  %v71_v33 = vld [vmem:[%s3153_s2 + $0x138] sm:$0xff] }
   0xc   :  { %264 = vmatpush.msra.mxu1 %v1751_v18  ;;  %227 = vmatpush.msra.mxu0 %v1759_v20  ;;  %3252 = vst [vmem:[#allocation11_spill] sm:$0xff] %v1795_v28  ;;  %v88_v31 = vld [vmem:[%s3153_s2 + $0x1c0] sm:$0xff]  ;;  %v1822_v34 = vld [vmem:[%s3153_s2 + $0xb8] sm:$0xff]  ;;  %v1831_v36 = vld [vmem:[%s3153_s2 + $0x30] sm:$0xff] }
   0xd   :  { %340 = vmatpush.msra.mxu3 %v91_v19  ;;  %303 = vmatpush.msra.mxu2 %v74_v21  ;;  %3253 = vst [vmem:[#allocation12_spill] sm:$0xff] %v1804_v30  ;;  %v87_v35 = vld [vmem:[%s3153_s2 + $0x1b8] sm:$0xff]  ;;  %v70_v37 = vld [vmem:[%s3153_s2 + $0x130] sm:$0xff]  ;;  %v1849_v40 = vld [vmem:[%s3153_s2 + $0x28] sm:$0xff] }
   0xe   :  { %265 = vmatpush.msra.mxu1 %v1768_v22  ;;  %228 = vmatpush.msra.mxu0 %v1777_v24  ;;  %3254 = vst [vmem:[#allocation13_spill] sm:$0xff] %v1813_v32  ;;  %v1840_v38 = vld [vmem:[%s3153_s2 + $0xb0] sm:$0xff]  ;;  %v69_v41 = vld [vmem:[%s3153_s2 + $0x128] sm:$0xff]  ;;  %v1867_v44 = vld [vmem:[%s3153_s2 + $0x20] sm:$0xff] }
   0xf   :  { %341 = vmatpush.msra.mxu3 %v90_v23  ;;  %304 = vmatpush.msra.mxu2 %v73_v25  ;;  %3255 = vst [vmem:[#allocation14_spill] sm:$0xff] %v1822_v34  ;;  %v86_v39 = vld [vmem:[%s3153_s2 + $0x1b0] sm:$0xff]  ;;  %v1858_v42 = vld [vmem:[%s3153_s2 + $0xa8] sm:$0xff]  ;;  %v1872_v45 = vld [vmem:[%s3153_s2 + $0x120] sm:$0xff] }
  0x10   :  { %266 = vmatpush.msra.mxu1 %v1786_v26  ;;  %229 = vmatpush.msra.mxu0 %v1795_v28  ;;  %3256 = vst [vmem:[#allocation15_spill] sm:$0xff] %v1831_v36  ;;  %v85_v43 = vld [vmem:[%s3153_s2 + $0x1a8] sm:$0xff]  ;;  %v1878_v46 = vld [vmem:[%s3153_s2 + $0xa0] sm:$0xff]  ;;  %v1887_v48 = vld [vmem:[%s3153_s2 + $0x18] sm:$0xff] }
  0x11   :  { %342 = vmatpush.msra.mxu3 %v89_v27  ;;  %305 = vmatpush.msra.mxu2 %v72_v29  ;;  %3257 = vst [vmem:[#allocation16_spill] sm:$0xff] %v1840_v38  ;;  %v84_v47 = vld [vmem:[%s3153_s2 + $0x1a0] sm:$0xff]  ;;  %v1892_v49 = vld [vmem:[%s3153_s2 + $0x118] sm:$0xff]  ;;  %v1908_v52 = vld [vmem:[%s3153_s2 + $0x10] sm:$0xff] }
  0x12   :  { %267 = vmatpush.msra.mxu1 %v1804_v30  ;;  %230 = vmatpush.msra.mxu0 %v1813_v32  ;;  %3258 = vst [vmem:[#allocation17_spill] sm:$0xff] %v1849_v40  ;;  %v1899_v50 = vld [vmem:[%s3153_s2 + $0x98] sm:$0xff]  ;;  %v1913_v53 = vld [vmem:[%s3153_s2 + $0x110] sm:$0xff]  ;;  %v1929_v56 = vld [vmem:[%s3153_s2 + $0x8] sm:$0xff] }
  0x13   :  { %343 = vmatpush.msra.mxu3 %v88_v31  ;;  %306 = vmatpush.msra.mxu2 %v71_v33  ;;  %3259 = vst [vmem:[#allocation18_spill] sm:$0xff] %v1858_v42  ;;  %v83_v51 = vld [vmem:[%s3153_s2 + $0x198] sm:$0xff]  ;;  %v1920_v54 = vld [vmem:[%s3153_s2 + $0x90] sm:$0xff]  ;;  %v1934_v57 = vld [vmem:[%s3153_s2 + $0x108] sm:$0xff] }
  0x14   :  { %268 = vmatpush.msra.mxu1 %v1822_v34  ;;  %231 = vmatpush.msra.mxu0 %v1831_v36  ;;  %3260 = vst [vmem:[#allocation19_spill] sm:$0xff] %v1867_v44  ;;  %v82_v55 = vld [vmem:[%s3153_s2 + $0x190] sm:$0xff]  ;;  %v1941_v58 = vld [vmem:[%s3153_s2 + $0x88] sm:$0xff]  ;;  %v1950_v60 = vld [vmem:[%s3153_s2] sm:$0xff] }
  0x15   :  { %344 = vmatpush.msra.mxu3 %v87_v35  ;;  %307 = vmatpush.msra.mxu2 %v70_v37  ;;  %3261 = vst [vmem:[#allocation20_spill] sm:$0xff] %v1872_v45  ;;  %v81_v59 = vld [vmem:[%s3153_s2 + $0x188] sm:$0xff]  ;;  %v1955_v61 = vld [vmem:[%s3153_s2 + $0x100] sm:$0xff]  ;;  %v168_v63 = vld [vmem:[%s3154_s0 + $0x10] sm:$0xff] }
  0x16   :  { %269 = vmatpush.msra.mxu1 %v1840_v38  ;;  %232 = vmatpush.msra.mxu0 %v1849_v40  ;;  %3262 = vst [vmem:[#allocation21_spill] sm:$0xff] %v1878_v46  ;;  %v166_v62 = vld [vmem:[%s3154_s0] sm:$0xff]  ;;  %v167_v4 = vld [vmem:[%s3154_s0 + $0x8] sm:$0xff]  ;;  %v169_v5 = vld [vmem:[%s3154_s0 + $0x18] sm:$0xff] }
  0x17   :  { %345 = vmatpush.msra.mxu3 %v86_v39  ;;  %308 = vmatpush.msra.mxu2 %v69_v41  ;;  %3263 = vst [vmem:[#allocation22_spill] sm:$0xff] %v1887_v48  ;;  %v1969_v1 = vld [vmem:[%s3153_s2 + $0x80] sm:$0xff]  ;;  %v1985_v7 = vld [vmem:[%s3153_s2 + $0x278] sm:$0xff]  ;;  %v2001_v10 = vld [vmem:[%s3153_s2 + $0x270] sm:$0xff] }
  0x18   :  { %270 = vmatpush.msra.mxu1 %v1858_v42  ;;  %3264 = vst [vmem:[#allocation23_spill] sm:$0xff] %v1892_v49  ;;  %233 = vmatpush.msra.mxu0 %v1867_v44  ;;  %v80_v3 = vld [vmem:[%s3153_s2 + $0x180] sm:$0xff]  ;;  %v1990_v8 = vld [vmem:[%s3153_s2 + $0x378] sm:$0xff]  ;;  %v2006_v12 = vld [vmem:[%s3153_s2 + $0x370] sm:$0xff] }
  0x19   :  { %346 = vmatpush.msra.mxu3 %v85_v43  ;;  %309 = vmatpush.msra.mxu2 %v1872_v45  ;;  %3265 = vst [vmem:[#allocation24_spill] sm:$0xff] %v1899_v50  ;;  %v1996_v9 = vld [vmem:[%s3153_s2 + $0x2f8] sm:$0xff]  ;;  %v2013_v13 = vld [vmem:[%s3153_s2 + $0x2f0] sm:$0xff]  ;;  %v2019_v14 = vld [vmem:[%s3153_s2 + $0x268] sm:$0xff] }
  0x1a   :  { %271 = vmatpush.msra.mxu1 %v1878_v46  ;;  %3266 = vst [vmem:[#allocation25_spill] sm:$0xff] %v1908_v52  ;;  %234 = vmatpush.msra.mxu0 %v1887_v48  ;;  %v2024_v15 = vld [vmem:[%s3153_s2 + $0x368] sm:$0xff]  ;;  %v173_v17 = vld [vmem:[%s3154_s0 + $0x38] sm:$0xff]  ;;  %v2038_v21 = vld [vmem:[%s3153_s2 + $0x260] sm:$0xff] }
  0x1b   :  { %347 = vmatpush.msra.mxu3 %v84_v47  ;;  %3267 = vst [vmem:[#allocation26_spill] sm:$0xff] %v1913_v53  ;;  %310 = vmatpush.msra.mxu2 %v1892_v49  ;;  %v175_v19 = vld [vmem:[%s3154_s0 + $0x48] sm:$0xff]  ;;  %v174_v25 = vld [vmem:[%s3154_s0 + $0x40] sm:$0xff]  ;;  %v176_v27 = vld [vmem:[%s3154_s0 + $0x50] sm:$0xff] }
  0x1c   :  { %3268 = vst [vmem:[#allocation27_spill] sm:$0xff] %v1920_v54  ;;  %272 = vmatpush.msra.mxu1 %v1899_v50  ;;  %235 = vmatpush.msra.mxu0 %v1908_v52  ;;  %v2043_v23 = vld [vmem:[%s3153_s2 + $0x2e8] sm:$0xff]  ;;  %v2056_v29 = vld [vmem:[%s3153_s2 + $0x360] sm:$0xff]  ;;  %v2061_v31 = vld [vmem:[%s3153_s2 + $0x258] sm:$0xff] }
  0x1d   :  { %348 = vmatpush.msra.mxu3 %v83_v51  ;;  %3269 = vst [vmem:[#allocation28_spill] sm:$0xff] %v1929_v56  ;;  %311 = vmatpush.msra.mxu2 %v1913_v53  ;;  %v2068_v33 = vld [vmem:[%s3153_s2 + $0x2e0] sm:$0xff]  ;;  %v2073_v35 = vld [vmem:[%s3153_s2 + $0x358] sm:$0xff]  ;;  %v2078_v37 = vld [vmem:[%s3153_s2 + $0x250] sm:$0xff] }
  0x1e   :  { %3270 = vst [vmem:[#allocation29_spill] sm:$0xff] %v1934_v57  ;;  %273 = vmatpush.msra.mxu1 %v1920_v54  ;;  %236 = vmatpush.msra.mxu0 %v1929_v56  ;;  %v2085_v39 = vld [vmem:[%s3153_s2 + $0x2d8] sm:$0xff]  ;;  %v2091_v41 = vld [vmem:[%s3153_s2 + $0x350] sm:$0xff]  ;;  %v2096_v43 = vld [vmem:[%s3153_s2 + $0x248] sm:$0xff] }
  0x1f   :  { %3271 = vst [vmem:[#allocation30_spill] sm:$0xff] %v1941_v58  ;;  %349 = vmatpush.msra.mxu3 %v82_v55  ;;  %312 = vmatpush.msra.mxu2 %v1934_v57  ;;  %v180_v47 = vld [vmem:[%s3154_s0 + $0x70] sm:$0xff]  ;;  %v182_v51 = vld [vmem:[%s3154_s0 + $0x80] sm:$0xff]  ;;  %v2277_v53 = vld [vmem:[%s3153_s2 + $0x208] sm:$0xff] }
  0x20   :  { %3272 = vst [vmem:[#allocation31_spill] sm:$0xff] %v1950_v60  ;;  %274 = vmatpush.msra.mxu1 %v1941_v58  ;;  %237 = vmatpush.msra.mxu0 %v1950_v60  ;;  %v2110_v55 = vld [vmem:[%s3153_s2 + $0x2d0] sm:$0xff]  ;;  %v2301_v49 = vld [vmem:[%s3153_s2 + $0x288] sm:$0xff]  ;;  %v2321_v45 = vld [vmem:[%s3153_s2 + $0x280] sm:$0xff] }
  0x21   :  { %3273 = vst [vmem:[#allocation32_spill] sm:$0xff] %v1955_v61  ;;  %350 = vmatpush.msra.mxu3 %v81_v59  ;;  %313 = vmatpush.msra.mxu2 %v1955_v61  ;;  %v2115_v59 = vld [vmem:[%s3153_s2 + $0x348] sm:$0xff]  ;;  %v2272_v57 = vld [vmem:[%s3153_s2 + $0x310] sm:$0xff] }
  0x22   :  { %3274 = vst [vmem:[#allocation33_spill] sm:$0xff] %v1969_v1  ;;  %238 = vmatmul.f32.vlgmr.msra.gmra.mxu0 %v166_v62  ;;  %314 = vmatmul.f32.vlgmr.msra.gmra.mxu2 %v168_v63  ;;  %v181_v62 = vld [vmem:[%s3154_s0 + $0x78] sm:$0xff]  ;;  %v183_v63 = vld [vmem:[%s3154_s0 + $0x88] sm:$0xff] }
  0x23   :  { %3275 = vst [vmem:[#allocation34_spill] sm:$0xff] %v1985_v7  ;;  %275 = vmatpush.msra.mxu1 %v1969_v1  ;;  %351 = vmatpush.msra.mxu3 %v80_v3  ;;  %v2128_v3 = vld [vmem:[%s3153_s2 + $0x240] sm:$0xff]  ;;  %v195_v61 = vld [vmem:[%s3154_s0 + $0xe8] sm:$0xff] }
  0x24   :  { %3276 = vst [vmem:[#allocation35_spill] sm:$0xff] %v1990_v8  ;;  %276 = vmatmul.f32.vlgmr.msra.gmra.mxu1 %v167_v4  ;;  %352 = vmatmul.f32.vlgmr.msra.gmra.mxu3 %v169_v5  ;;  %v2133_v4 = vld [vmem:[%s3153_s2 + $0x2c8] sm:$0xff]  ;;  %v2140_v5 = vld [vmem:[%s3153_s2 + $0x340] sm:$0xff] }
  0x25   :  { %3277 = vst [vmem:[#allocation36_spill] sm:$0xff] %v1996_v9  ;;  %374 = vmatpush.msrb.mxu0 %v1985_v7  ;;  %450 = vmatpush.msrb.mxu2 %v1990_v8  ;;  %v2259_v8 = vld [vmem:[%s3153_s2 + $0x298] sm:$0xff] }
  0x26   :  { %3278 = vst [vmem:[#allocation37_spill] sm:$0xff] %v2001_v10  ;;  %412 = vmatpush.msrb.mxu1 %v1996_v9 }
  0x27   :  { %3279 = vst [vmem:[#allocation38_spill] sm:$0xff] %v2006_v12  ;;  %375 = vmatpush.msrb.mxu0 %v2001_v10  ;;  %451 = vmatpush.msrb.mxu2 %v2006_v12  ;;  %v2254_v12 = vld [vmem:[%s3153_s2 + $0x210] sm:$0xff] }
  0x28   :  { %3280 = vst [vmem:[#allocation39_spill] sm:$0xff] %v2013_v13  ;;  %413 = vmatpush.msrb.mxu1 %v2013_v13 }
  0x29   :  { %3281 = vst [vmem:[#allocation40_spill] sm:$0xff] %v2019_v14  ;;  %376 = vmatpush.msrb.mxu0 %v2019_v14  ;;  %452 = vmatpush.msrb.mxu2 %v2024_v15 }
  0x2a   :  { %3282 = vst [vmem:[#allocation41_spill] sm:$0xff] %v2024_v15  ;;  %241 = vmatmul.f32.gmra.mxu0 %v173_v17  ;;  %317 = vmatmul.f32.gmra.mxu2 %v175_v19  ;;  %v2145_v17 = vld [vmem:[%s3153_s2 + $0x238] sm:$0xff]  ;;  %v2150_v19 = vld [vmem:[%s3153_s2 + $0x2c0] sm:$0xff]  ;;  %v196_v15 = vld [vmem:[%s3154_s0 + $0xf0] sm:$0xff] }
  0x2b   :  { %3283 = vst [vmem:[#allocation42_spill] sm:$0xff] %v2038_v21  ;;  %377 = vmatpush.msrb.mxu0 %v2038_v21  ;;  %414 = vmatpush.msrb.mxu1 %v2043_v23 }
  0x2c   :  { %3284 = vst [vmem:[#allocation43_spill] sm:$0xff] %v2043_v23  ;;  %279 = vmatmul.f32.gmra.mxu1 %v174_v25  ;;  %355 = vmatmul.f32.gmra.mxu3 %v176_v27  ;;  %v2157_v25 = vld [vmem:[%s3153_s2 + $0x338] sm:$0xff]  ;;  %v2163_v27 = vld [vmem:[%s3153_s2 + $0x230] sm:$0xff] }
  0x2d   :  { %3285 = vst [vmem:[#allocation44_spill] sm:$0xff] %v2056_v29  ;;  %453 = vmatpush.msrb.mxu2 %v2056_v29  ;;  %378 = vmatpush.msrb.mxu0 %v2061_v31  ;;  %v2212_v29 = vld [vmem:[%s3153_s2 + $0x220] sm:$0xff] }
  0x2e   :  { %3286 = vst [vmem:[#allocation45_spill] sm:$0xff] %v2061_v31  ;;  %415 = vmatpush.msrb.mxu1 %v2068_v33 }
  0x2f   :  { %3287 = vst [vmem:[#allocation46_spill] sm:$0xff] %v2068_v33  ;;  %454 = vmatpush.msrb.mxu2 %v2073_v35  ;;  %379 = vmatpush.msrb.mxu0 %v2078_v37 }
  0x30   :  { %3288 = vst [vmem:[#allocation47_spill] sm:$0xff] %v2073_v35  ;;  %416 = vmatpush.msrb.mxu1 %v2085_v39  ;;  %v2205_v35 = vld [vmem:[%s3153_s2 + $0x328] sm:$0xff] }
  0x31   :  { %3289 = vst [vmem:[#allocation48_spill] sm:$0xff] %v2078_v37  ;;  %455 = vmatpush.msrb.mxu2 %v2091_v41  ;;  %380 = vmatpush.msrb.mxu0 %v2096_v43 }
  0x32   :  { %3290 = vst [vmem:[#allocation49_spill] sm:$0xff] %v2085_v39  ;;  %244 = vmatmul.f32.gmra.mxu0 %v180_v47  ;;  %320 = vmatmul.f32.gmra.mxu2 %v182_v51  ;;  %v2168_v47 = vld [vmem:[%s3153_s2 + $0x2b8] sm:$0xff]  ;;  %v187_v51 = vld [vmem:[%s3154_s0 + $0xa8] sm:$0xff] }
  0x33   :  { %3291 = vst [vmem:[#allocation50_spill] sm:$0xff] %v2091_v41  ;;  %417 = vmatpush.msrb.mxu1 %v2110_v55  ;;  %456 = vmatpush.msrb.mxu2 %v2115_v59  ;;  %v190_v41 = vld [vmem:[%s3154_s0 + $0xc0] sm:$0xff] }
  0x34   :  { %3292 = vst [vmem:[#allocation51_spill] sm:$0xff] %v2096_v43  ;;  %282 = vmatmul.f32.gmra.mxu1 %v181_v62  ;;  %358 = vmatmul.f32.gmra.mxu3 %v183_v63  ;;  %v189_v62 = vld [vmem:[%s3154_s0 + $0xb8] sm:$0xff]  ;;  %v2182_v63 = vld [vmem:[%s3153_s2 + $0x330] sm:$0xff] }
  0x35   :  { %3293 = vst [vmem:[#allocation52_spill] sm:$0xff] %v2110_v55  ;;  %381 = vmatpush.msrb.mxu0 %v2128_v3  ;;  %418 = vmatpush.msrb.mxu1 %v2133_v4 }
  0x36   :  { %3294 = vst [vmem:[#allocation53_spill] sm:$0xff] %v2115_v59  ;;  %457 = vmatpush.msrb.mxu2 %v2140_v5  ;;  %v188_v59 = vld [vmem:[%s3154_s0 + $0xb0] sm:$0xff] }
  0x37   :  { %3295 = vst [vmem:[#allocation54_spill] sm:$0xff] %v2128_v3  ;;  %382 = vmatpush.msrb.mxu0 %v2145_v17  ;;  %419 = vmatpush.msrb.mxu1 %v2150_v19 }
  0x38   :  { %3296 = vst [vmem:[#allocation55_spill] sm:$0xff] %v2133_v4  ;;  %458 = vmatpush.msrb.mxu2 %v2157_v25 }
  0x39   :  { %3297 = vst [vmem:[#allocation56_spill] sm:$0xff] %v2140_v5  ;;  %v2187_v5 = vld [vmem:[%s3153_s2 + $0x228] sm:$0xff]  ;;  %383 = vmatpush.msrb.mxu0 %v2163_v27  ;;  %420 = vmatpush.msrb.mxu1 %v2168_v47 }
  0x3a   :  { %3298 = vst [vmem:[#allocation57_spill] sm:$0xff] %v2145_v17  ;;  %247 = vmatmul.f32.gmra.mxu0 %v187_v51  ;;  %323 = vmatmul.f32.gmra.mxu2 %v189_v62  ;;  %v2217_v51 = vld [vmem:[%s3153_s2 + $0x2a8] sm:$0xff]  ;;  %v2222_v62 = vld [vmem:[%s3153_s2 + $0x320] sm:$0xff] }
  0x3b   :  { %3299 = vst [vmem:[#allocation58_spill] sm:$0xff] %v2150_v19  ;;  %459 = vmatpush.msrb.mxu2 %v2182_v63  ;;  %384 = vmatpush.msrb.mxu0 %v2187_v5 }
  0x3c   :  { %3300 = vst [vmem:[#allocation59_spill] sm:$0xff] %v2157_v25  ;;  %v2200_v25 = vld [vmem:[%s3153_s2 + $0x2b0] sm:$0xff]  ;;  %285 = vmatmul.f32.gmra.mxu1 %v188_v59  ;;  %361 = vmatmul.f32.gmra.mxu3 %v190_v41  ;;  %v2235_v41 = vld [vmem:[%s3153_s2 + $0x2a0] sm:$0xff]  ;;  %v2240_v59 = vld [vmem:[%s3153_s2 + $0x318] sm:$0xff] }
  0x3d   :  { %3301 = vst [vmem:[#allocation60_spill] sm:$0xff] %v2163_v27  ;;  %421 = vmatpush.msrb.mxu1 %v2200_v25  ;;  %460 = vmatpush.msrb.mxu2 %v2205_v35 }
  0x3e   :  { %3302 = vst [vmem:[#allocation61_spill] sm:$0xff] %v2168_v47  ;;  %385 = vmatpush.msrb.mxu0 %v2212_v29 }
  0x3f   :  { %3303 = vst [vmem:[#allocation62_spill] sm:$0xff] %v2182_v63  ;;  %v2229_v63 = vld [vmem:[%s3153_s2 + $0x218] sm:$0xff]  ;;  %422 = vmatpush.msrb.mxu1 %v2217_v51  ;;  %461 = vmatpush.msrb.mxu2 %v2222_v62 }
  0x40   :  { %3304 = vst [vmem:[#allocation63_spill] sm:$0xff] %v2187_v5  ;;  %386 = vmatpush.msrb.mxu0 %v2229_v63 }
  0x41   :  { %3305 = vst [vmem:[#allocation64_spill] sm:$0xff] %v2200_v25  ;;  %423 = vmatpush.msrb.mxu1 %v2235_v41  ;;  %462 = vmatpush.msrb.mxu2 %v2240_v59 }
  0x42   :  { %3306 = vst [vmem:[#allocation65_spill] sm:$0xff] %v2205_v35  ;;  %v194_v35 = vld [vmem:[%s3154_s0 + $0xe0] sm:$0xff]  ;;  %326 = vmatmul.f32.gmra.mxu2 %v196_v15  ;;  %387 = vmatpush.msrb.mxu0 %v2254_v12  ;;  %v2289_v15 = vld [vmem:[%s3153_s2 + $0x308] sm:$0xff] }
  0x43   :  { %3307 = vst [vmem:[#allocation66_spill] sm:$0xff] %v2212_v29  ;;  %250 = vmatmul.f32.gmra.mxu0 %v194_v35  ;;  %424 = vmatpush.msrb.mxu1 %v2259_v8  ;;  %v2294_v35 = vld [vmem:[%s3153_s2 + $0x200] sm:$0xff] }
  0x44   :  { %3308 = vst [vmem:[#allocation67_spill] sm:$0xff] %v2217_v51  ;;  %288 = vmatmul.f32.gmra.mxu1 %v195_v61  ;;  %463 = vmatpush.msrb.mxu2 %v2272_v57  ;;  %v2307_v61 = vld [vmem:[%s3153_s2 + $0x300] sm:$0xff] }
  0x45   :  { %3309 = vst [vmem:[#allocation68_spill] sm:$0xff] %v2222_v62  ;;  %v197_v62 = vld [vmem:[%s3154_s0 + $0xf8] sm:$0xff]  ;;  %388 = vmatpush.msrb.mxu0 %v2277_v53 }
  0x46   :  { %3310 = vst [vmem:[#allocation69_spill] sm:$0xff] %v2229_v63  ;;  %364 = vmatmul.f32.gmra.mxu3 %v197_v62  ;;  %v201_v62 = vld [vmem:[%s3154_s0 + $0x118] sm:$0xff]  ;;  %464 = vmatpush.msrb.mxu2 %v2289_v15 }
  0x47   :  { %3311 = vst [vmem:[#allocation70_spill] sm:$0xff] %v2235_v41  ;;  %389 = vmatpush.msrb.mxu0 %v2294_v35  ;;  %v209_v41 = vld [vmem:[%s3154_s0 + $0x158] sm:$0x3] }
  0x48   :  { %3312 = vst [vmem:[#allocation71_spill] sm:$0xff] %v2240_v59  ;;  %v2284_v59 = vld [vmem:[%s3153_s2 + $0x290] sm:$0xff]  ;;  %465 = vmatpush.msrb.mxu2 %v2307_v61 }
  0x49   :  { %3313 = vst [vmem:[#allocation72_spill] sm:$0xff] %v2254_v12  ;;  %425 = vmatpush.msrb.mxu1 %v2284_v59 }
  0x4a   :  { %3314 = vst [vmem:[#allocation73_spill] sm:$0xff] %v2259_v8  ;;  %v204_v8 = vld [vmem:[%s3154_s0 + $0x130] sm:$0xff] }
  0x4b   :  { %3315 = vst [vmem:[#allocation74_spill] sm:$0xff] %v2272_v57  ;;  %v203_v57 = vld [vmem:[%s3154_s0 + $0x128] sm:$0xff]  ;;  %426 = vmatpush.msrb.mxu1 %v2301_v49  ;;  %253 = vmatmul.f32.gmra.mxu0 %v201_v62 }
  0x4c   :  { %3316 = vst [vmem:[#allocation75_spill] sm:$0xff] %v2277_v53  ;;  %329 = vmatmul.f32.gmra.mxu2 %v203_v57  ;;  %v211_v57 = vld [vmem:[%s3154_s0 + $0x168] sm:$0x3] }
  0x4d   :  { %3317 = vst [vmem:[#allocation76_spill] sm:$0xff] %v2284_v59  ;;  %v202_v59 = vld [vmem:[%s3154_s0 + $0x120] sm:$0xff]  ;;  %427 = vmatpush.msrb.mxu1 %v2321_v45  ;;  %v171_v62 = vld [vmem:[%s3154_s0 + $0x28] sm:$0xff] }
  0x4e   :  { %3318 = vst [vmem:[#allocation77_spill] sm:$0xff] %v2289_v15  ;;  %291 = vmatmul.f32.gmra.mxu1 %v202_v59  ;;  %367 = vmatmul.f32.gmra.mxu3 %v204_v8  ;;  %v208_v15 = vld [vmem:[%s3154_s0 + $0x150] sm:$0x3]  ;;  %v170_v8 = vld [vmem:[%s3154_s0 + $0x20] sm:$0xff] }
  0x4f   :  { %3319 = vst [vmem:[#allocation78_spill] sm:$0xff] %v2294_v35  ;;  %v172_v59 = vld [vmem:[%s3154_s0 + $0x30] sm:$0xff] }
  0x50   :  { %3320 = vst [vmem:[#allocation79_spill] sm:$0xff] %v2301_v49  ;;  %v210_v49 = vld [vmem:[%s3154_s0 + $0x160] sm:$0x3] }
  0x51   :  { %3321 = vst [vmem:[#allocation80_spill] sm:$0xff] %v2307_v61 }
  0x52   :  { %3322 = vst [vmem:[#allocation81_spill] sm:$0xff] %v2321_v45 }
  0x53   :  { %256 = vmatmul.f32.gmra.mxu0 %v208_v15  ;;  %v178_v15 = vld [vmem:[%s3154_s0 + $0x60] sm:$0xff] }
  0x54   :  { %332 = vmatmul.f32.gmra.mxu2 %v210_v49  ;;  %v177_v49 = vld [vmem:[%s3154_s0 + $0x58] sm:$0xff] }
  0x56   :  { %294 = vmatmul.f32.gmra.mxu1 %v209_v41  ;;  %370 = vmatmul.f32.gmra.mxu3 %v211_v57  ;;  %v179_v41 = vld [vmem:[%s3154_s0 + $0x68] sm:$0xff]  ;;  %v184_v57 = vld [vmem:[%s3154_s0 + $0x90] sm:$0xff] }
  0x5b   :  { %390 = vmatmul.f32.vlgmr.msrb.gmra.mxu0 %v170_v8  ;;  %v186_v8 = vld [vmem:[%s3154_s0 + $0xa0] sm:$0xff] }
  0x5c   :  { %466 = vmatmul.f32.vlgmr.msrb.gmra.mxu2 %v172_v59  ;;  %v185_v59 = vld [vmem:[%s3154_s0 + $0x98] sm:$0xff] }
  0x5e   :  { %428 = vmatmul.f32.vlgmr.msrb.gmra.mxu1 %v171_v62  ;;  %v191_v62 = vld [vmem:[%s3154_s0 + $0xc8] sm:$0xff] }
  0x63   :  { %393 = vmatmul.f32.gmra.mxu0 %v177_v49  ;;  %v193_v49 = vld [vmem:[%s3154_s0 + $0xd8] sm:$0xff] }
  0x64   :  { %469 = vmatmul.f32.gmra.mxu2 %v179_v41  ;;  %v192_v41 = vld [vmem:[%s3154_s0 + $0xd0] sm:$0xff] }
  0x66   :  { %431 = vmatmul.f32.gmra.mxu1 %v178_v15  ;;  %v198_v15 = vld [vmem:[%s3154_s0 + $0x100] sm:$0xff] }
  0x6b   :  { %396 = vmatmul.f32.gmra.mxu0 %v184_v57  ;;  %v200_v57 = vld [vmem:[%s3154_s0 + $0x110] sm:$0xff] }
  0x6c   :  { %472 = vmatmul.f32.gmra.mxu2 %v186_v8  ;;  %v199_v8 = vld [vmem:[%s3154_s0 + $0x108] sm:$0xff] }
  0x6e   :  { %434 = vmatmul.f32.gmra.mxu1 %v185_v59  ;;  %v205_v59 = vld [vmem:[%s3154_s0 + $0x138] sm:$0xff] }
  0x73   :  { %399 = vmatmul.f32.gmra.mxu0 %v191_v62  ;;  %v207_v62 = vld [vmem:[%s3154_s0 + $0x148] sm:$0xff] }
  0x74   :  { %475 = vmatmul.f32.gmra.mxu2 %v193_v49  ;;  %v206_v49 = vld [vmem:[%s3154_s0 + $0x140] sm:$0xff] }
  0x76   :  { %437 = vmatmul.f32.gmra.mxu1 %v192_v41  ;;  %v212_v41 = vld [vmem:[%s3154_s0 + $0x170] sm:$0x3] }
  0x7b   :  { %402 = vmatmul.f32.gmra.mxu0 %v198_v15  ;;  %v214_v15 = vld [vmem:[%s3154_s0 + $0x180] sm:$0x3] }
  0x7c   :  { %478 = vmatmul.f32.gmra.mxu2 %v200_v57  ;;  %v213_v57 = vld [vmem:[%s3154_s0 + $0x178] sm:$0x3] }
  0x7e   :  { %440 = vmatmul.f32.gmra.mxu1 %v199_v8 }
  0x83   :  { %405 = vmatmul.f32.gmra.mxu0 %v205_v59 }
  0x84   :  { %481 = vmatmul.f32.gmra.mxu2 %v207_v62 }
  0x86   :  { %443 = vmatmul.f32.gmra.mxu1 %v206_v49 }
  0x8b   :  { %408 = vmatmul.f32.gmra.mxu0 %v212_v41 }
  0x8c   :  { %484 = vmatmul.f32.gmra.mxu2 %v214_v15 }
  0x8e   :  { %446 = vmatmul.f32.gmra.mxu1 %v213_v57 }
  0x9f   :  { %v2406_v8 = vpop.f32.mrf.mxu0 }
  0xa1   :  { %v2408_v59 = vpop.f32.mrf.mxu1 }
  0xa5   :  { %v2410_v62 = vpop.f32.mrf.mxu2 }
  0xa7   :  { %v242_v49 = vpop.f32.mrf.mxu0  ;;  %v2412_v15 = vpop.f32.mrf.mxu3 }
  0xa9   :  { %v280_v61 = vpop.f32.mrf.mxu1 }
  0xaa   :  { %v281_v11 = vadd.f32 %v280_v61, %v242_v49  ;;  %v3335_v61 = vld [vmem:[#allocation25_spill] sm:$0xff] }
  0xad   :  { %v318_v45 = vpop.f32.mrf.mxu2 }
  0xaf   :  { %v245_v51 = vpop.f32.mrf.mxu0  ;;  %v356_v1 = vpop.f32.mrf.mxu3 }
  0xb1   :  { %v283_v25 = vpop.f32.mrf.mxu1 }
  0xb2   :  { %v284_v32 = vadd.f32 %v283_v25, %v245_v51  ;;  %v3329_v25 = vld [vmem:[#allocation11_spill] sm:$0xff]  ;;  %v2543_v51 = vld [vmem:[%s3155_s3] ss:$0 sm:$0xff] }
  0xb5   :  { %v321_v47 = vpop.f32.mrf.mxu2 }
  0xb6   :  { %v322_v6 = vadd.f32 %v321_v47, %v284_v32  ;;  %v3331_v47 = vld [vmem:[#allocation15_spill] sm:$0xff] }
  0xb7   :  { %v248_v19 = vpop.f32.mrf.mxu0  ;;  %v359_v42 = vpop.f32.mrf.mxu3 }
  0xb9   :  { %v286_v4 = vpop.f32.mrf.mxu1 }
  0xba   :  { %v287_v48 = vadd.f32 %v286_v4, %v248_v19  ;;  %v3325_v4 = vld [vmem:[#allocation4_spill] sm:$0xff]  ;;  %v3328_v19 = vld [vmem:[#allocation9_spill] sm:$0xff] }
  0xbd   :  { %v324_v55 = vpop.f32.mrf.mxu2 }
  0xbe   :  { %v325_v28 = vadd.f32 %v324_v55, %v287_v48  ;;  %v3323_v55 = vld [vmem:[#allocation2_spill] sm:$0xff] }
  0xbf   :  { %v362_v26 = vpop.f32.mrf.mxu3 }
  0xc0   :  { %v251_v39 = vpop.f32.mrf.mxu0 }
  0xc1   :  { %v289_v33 = vpop.f32.mrf.mxu1 }
  0xc2   :  { %v290_v60 = vadd.f32 %v289_v33, %v251_v39  ;;  %v2506_v33 = vld [vmem:[%s3156_s1 + $0x30] sm:$0x3]  ;;  %v2519_v39 = vld [vmem:[%s3157_s4 + $0x8] sm:$0xff] }
  0xc5   :  { %v327_v41 = vpop.f32.mrf.mxu2 }
  0xc6   :  { %v328_v44 = vadd.f32 %v327_v41, %v290_v60  ;;  %v3337_v41 = vld [vmem:[#allocation31_spill] sm:$0xff] }
  0xc8   :  { %v254_v57 = vpop.f32.mrf.mxu0 }
  0xc9   :  { %v365_v12 = vpop.f32.mrf.mxu3 }
  0xca   :  { %v366_v2 = vadd.f32 %v365_v12, %v328_v44  ;;  %v2483_v12 = vld [vmem:[%s3157_s4 + $0x18] sm:$0xff] }
  0xcb   :  { %v292_v23 = vpop.f32.mrf.mxu1 }
  0xcc   :  { %v293_v14 = vadd.f32 %v292_v23, %v254_v57  ;;  %v363_v23 = vadd.f32 %v362_v26, %v325_v28 }
  0xcf   :  { %v330_v13 = vpop.f32.mrf.mxu2 }
  0xd0   :  { %v257_v9 = vpop.f32.mrf.mxu0  ;;  %v331_v56 = vadd.f32 %v330_v13, %v293_v14 }
  0xd1   :  { %v368_v17 = vpop.f32.mrf.mxu3 }
  0xd2   :  { %v369_v24 = vadd.f32 %v368_v17, %v331_v56  ;;  %v3327_v17 = vld [vmem:[#allocation7_spill] sm:$0xff] }
  0xd3   :  { %v295_v58 = vpop.f32.mrf.mxu1 }
  0xd4   :  { %v296_v31 = vadd.f32 %v295_v58, %v257_v9  ;;  %v319_v9 = vadd.f32 %v318_v45, %v281_v11 }
  0xd7   :  { %v333_v54 = vpop.f32.mrf.mxu2 }
  0xd8   :  { %v2414_v50 = vpop.f32.mrf.mxu0  ;;  %v334_v10 = vadd.f32 %v333_v54, %v296_v31  ;;  %v278_v54 = vadd.f32 %v2408_v59, %v2406_v8 }
  0xd9   :  { %v371_v7 = vpop.f32.mrf.mxu3 }
  0xda   :  { %v372_v40 = vadd.f32 %v371_v7, %v334_v10  ;;  %v316_v60 = vadd.f32 %v2410_v62, %v278_v54  ;;  %v360_v10 = vadd.f32 %v359_v42, %v322_v6  ;;  %v3336_v62 = vld [vmem:[#allocation28_spill] sm:$0xff] }
  0xdb   :  { %v2416_v46 = vpop.f32.mrf.mxu1 }
  0xdc   :  { %v354_v44 = vadd.f32 %v2412_v15, %v316_v60  ;;  %v3338_v15 = vld [vmem:[#allocation34_spill] sm:$0xff] }
  0xdf   :  { %v2418_v38 = vpop.f32.mrf.mxu2 }
  0xe0   :  { %v394_v34 = vpop.f32.mrf.mxu0 }
  0xe3   :  { %v432_v30 = vpop.f32.mrf.mxu1 }
  0xe7   :  { %v2420_v22 = vpop.f32.mrf.mxu2 }
  0xe8   :  { %v397_v18 = vpop.f32.mrf.mxu0 }
  0xe9   :  { %v398_v31 = vadd.f32 %v397_v18, %v360_v10 }
  0xeb   :  { %v435_v35 = vpop.f32.mrf.mxu1 }
  0xef   :  { %v473_v53 = vpop.f32.mrf.mxu2 }
  0xf0   :  { %v400_v63 = vpop.f32.mrf.mxu0 }
  0xf1   :  { %v401_v48 = vadd.f32 %v400_v63, %v363_v23  ;;  %v3332_v63 = vld [vmem:[#allocation17_spill] sm:$0xff] }
  0xf3   :  { %v438_v29 = vpop.f32.mrf.mxu1 }
  0xf4   :  { %v439_v26 = vadd.f32 %v438_v29, %v401_v48  ;;  %v2499_v29 = vld [vmem:[%s3156_s1 + $0x28] sm:$0xff] }
  0xf5   :  { %v3344_v48 = vld [vmem:[#allocation51_spill] sm:$0xff] }
  0xf7   :  { %v476_v5 = vpop.f32.mrf.mxu2 }
  0xf8   :  { %v403_v27 = vpop.f32.mrf.mxu0  ;;  %v477_v6 = vadd.f32 %v476_v5, %v439_v26  ;;  %v3326_v5 = vld [vmem:[#allocation5_spill] sm:$0xff]  ;;  %v3349_v26 = vld [vmem:[#allocation66_spill] sm:$0xff] }
  0xf9   :  { %v404_v13 = vadd.f32 %v403_v27, %v366_v2  ;;  %v3330_v27 = vld [vmem:[#allocation13_spill] sm:$0xff] }
  0xfb   :  { %v441_v3 = vpop.f32.mrf.mxu1 }
  0xfc   :  { %v442_v32 = vadd.f32 %v441_v3, %v404_v13  ;;  %v3324_v3 = vld [vmem:[#allocation3_spill] sm:$0xff]  ;;  %v3341_v13 = vld [vmem:[#allocation42_spill] sm:$0xff] }
  0xff   :  { %v479_v43 = vpop.f32.mrf.mxu2 }
 0x100   :  { %v406_v37 = vpop.f32.mrf.mxu0  ;;  %v480_v2 = vadd.f32 %v479_v43, %v442_v32  ;;  %v2525_v43 = vld [vmem:[%s3157_s4] sm:$0xff]  ;;  %v3347_v32 = vld [vmem:[#allocation60_spill] sm:$0xff] }
 0x101   :  { %v407_v58 = vadd.f32 %v406_v37, %v369_v24  ;;  %v2513_v37 = vld [vmem:[%s3157_s4 + $0x10] sm:$0xff] }
 0x103   :  { %v444_v21 = vpop.f32.mrf.mxu1 }
 0x104   :  { %v445_v56 = vadd.f32 %v444_v21, %v407_v58  ;;  %v2492_v21 = vld [vmem:[%s3156_s1 + $0x20] sm:$0xff]  ;;  %v3339_v58 = vld [vmem:[#allocation37_spill] sm:$0xff] }
 0x107   :  { %v482_v52 = vpop.f32.mrf.mxu2 }
 0x108   :  { %v409_v36 = vpop.f32.mrf.mxu0  ;;  %v483_v24 = vadd.f32 %v482_v52, %v445_v56 }
 0x109   :  { %v410_v20 = vadd.f32 %v409_v36, %v372_v40  ;;  %v357_v40 = vadd.f32 %v356_v1, %v319_v9  ;;  %v2477_v1 = vld [vmem:[%s3156_s1 + $0x18] sm:$0xff]  ;;  %v3340_v9 = vld [vmem:[#allocation40_spill] sm:$0xff] }
 0x10b   :  { %v447_v16 = vpop.f32.mrf.mxu1  ;;  %v395_v11 = vadd.f32 %v394_v34, %v357_v40  ;;  %v2434_v34 = vld [vmem:[%s3156_s1] sm:$0xff]  ;;  %v3346_v40 = vld [vmem:[#allocation57_spill] sm:$0xff] }
 0x10c   :  { %v448_v14 = vadd.f32 %v447_v16, %v410_v20  ;;  %v392_v16 = vadd.f32 %v2414_v50, %v354_v44  ;;  %v436_v20 = vadd.f32 %v435_v35, %v398_v31  ;;  %v2466_v50 = vld [vmem:[%s3157_s4 + $0x28] sm:$0xff]  ;;  %v3334_v35 = vld [vmem:[#allocation22_spill] sm:$0xff] }
 0x10d   :  { %v433_v28 = vadd.f32 %v432_v30, %v395_v11  ;;  %v2441_v30 = vld [vmem:[%s3156_s1 + $0x8] sm:$0xff] }
 0x10e   :  { %v474_v42 = vadd.f32 %v473_v53, %v436_v20  ;;  %v430_v18 = vadd.f32 %v2416_v46, %v392_v16  ;;  %v2460_v46 = vld [vmem:[%s3157_s4 + $0x30] sm:$0xff]  ;;  %v2472_v53 = vld [vmem:[%s3157_s4 + $0x20] sm:$0xff]  ;;  %v3348_v44 = vld [vmem:[#allocation63_spill] sm:$0xff] }
 0x10f   :  { %v485_v7 = vpop.f32.mrf.mxu2  ;;  %v471_v45 = vadd.f32 %v2420_v22, %v433_v28  ;;  %v2448_v22 = vld [vmem:[%s3156_s1 + $0x10] sm:$0xff]  ;;  %v3352_v28 = vld [vmem:[#allocation75_spill] sm:$0xff] }
 0x110   :  { %v486_v36 = vadd.f32 %v485_v7, %v448_v14  ;;  %v468_v52 = vadd.f32 %v2418_v38, %v430_v18  ;;  %v2455_v38 = vld [vmem:[%s3157_s4 + $0x38] sm:$0xff]  ;;  %v3343_v7 = vld [vmem:[#allocation48_spill] sm:$0xff]  ;;  %v3353_v18 = vld [vmem:[#allocation78_spill] sm:$0xff] }
 0x111   :  { %592 = vmatpush.msra.mxu0 %v2455_v38  ;;  %v3342_v14 = vld [vmem:[#allocation45_spill] sm:$0xff]  ;;  %v3351_v20 = vld [vmem:[#allocation72_spill] sm:$0xff] }
 0x112   :  { %1458 = vmatpush.msk.msrb.mxu3 %vm513_vm0, %v486_v36  ;;  %v3345_v36 = vld [vmem:[#allocation54_spill] sm:$0xff] }
 0x113   :  { %593 = vmatpush.msra.mxu0 %v2460_v46 }
 0x114   :  { %527 = vmatpush.msrb.mxu3 %v483_v24 }
 0x115   :  { %594 = vmatpush.msra.mxu0 %v2466_v50 }
 0x116   :  { %528 = vmatpush.msrb.mxu3 %v480_v2  ;;  %v3350_v2 = vld [vmem:[#allocation69_spill] sm:$0xff] }
 0x117   :  { %595 = vmatpush.msra.mxu0 %v2472_v53 }
 0x118   :  { %529 = vmatpush.msrb.mxu3 %v477_v6 }
 0x119   :  { %596 = vmatpush.msra.mxu0 %v2483_v12 }
 0x11a   :  { %530 = vmatpush.msrb.mxu3 %v474_v42 }
 0x11b   :  { %597 = vmatpush.msra.mxu0 %v2513_v37 }
 0x11c   :  { %531 = vmatpush.msrb.mxu3 %v471_v45 }
 0x11d   :  { %598 = vmatpush.msra.mxu0 %v2519_v39 }
 0x11e   :  { %532 = vmatpush.msrb.mxu3 %v468_v52 }
 0x11f   :  { %1459 = vmatmul.msk.f32.vlgmr.msrb.gmra.mxu3 %vm491_vm1, %v2434_v34  ;;  %599 = vmatpush.msra.mxu0 %v2525_v43 }
 0x121   :  { %889 = vmatpush.msrb.mxu0 %v1683_v0  ;;  %v3333_v0 = vld [vmem:[#allocation19_spill] sm:$0xff] }
 0x123   :  { %890 = vmatpush.msrb.mxu0 %v3323_v55 }
 0x125   :  { %891 = vmatpush.msrb.mxu0 %v3324_v3 }
 0x127   :  { %1460 = vmatmul.msk.f32.gmra.mxu3 %vm491_vm1, %v2441_v30  ;;  %892 = vmatpush.msrb.mxu0 %v3325_v4 }
 0x129   :  { %893 = vmatpush.msrb.mxu0 %v3326_v5 }
 0x12b   :  { %894 = vmatpush.msrb.mxu0 %v3327_v17 }
 0x12d   :  { %895 = vmatpush.msrb.mxu0 %v3328_v19 }
 0x12f   :  { %1461 = vmatmul.msk.f32.gmra.mxu3 %vm491_vm1, %v2448_v22  ;;  %896 = vmatpush.msrb.mxu0 %v3329_v25 }
 0x131   :  { %897 = vmatpush.msrb.mxu0 %v3330_v27 }
 0x133   :  { %898 = vmatpush.msrb.mxu0 %v3331_v47 }
 0x135   :  { %899 = vmatpush.msrb.mxu0 %v3332_v63 }
 0x137   :  { %1462 = vmatmul.msk.f32.gmra.mxu3 %vm491_vm1, %v2477_v1  ;;  %900 = vmatpush.msrb.mxu0 %v3333_v0 }
 0x139   :  { %901 = vmatpush.msrb.mxu0 %v3334_v35  ;;  %v1597_v35 = vld [vmem:[%s3153_s2 + $0xf8] sm:$0xff] }
 0x13b   :  { %902 = vmatpush.msrb.mxu0 %v3335_v61  ;;  %v1598_v61 = vld [vmem:[%s3153_s2 + $0xf0] sm:$0xff] }
 0x13d   :  { %903 = vmatpush.msrb.mxu0 %v3336_v62  ;;  %v3354_v62 = vld [vmem:[#allocation6_spill] sm:$0xff] }
 0x13f   :  { %1463 = vmatmul.msk.f32.gmra.mxu3 %vm491_vm1, %v2492_v21  ;;  %904 = vmatpush.msrb.mxu0 %v3337_v41  ;;  %v3356_v41 = vld [vmem:[#allocation10_spill] sm:$0xff] }
 0x147   :  { %1464 = vmatmul.msk.f32.gmra.mxu3 %vm491_vm1, %v2499_v29 }
 0x14f   :  { %1465 = vmatmul.msk.f32.gmra.mxu3 %vm491_vm1, %v2506_v33 }
 0x1a2   :  { %v534_v8 = vpop.f32.mrf.mxu3 }
 0x1a3   :  { %v535_v59 = vadd.f32 %v2543_v51, %v534_v8  ;;  %v1599_v8 = vld [vmem:[%s3153_s2 + $0xe8] sm:$0xff] }
 0x1a5   :  { %v555_v49 = vmax.f32 %v535_v59, 0.0  ;;  %v1600_v59 = vld [vmem:[%s3153_s2 + $0xe0] sm:$0xff] }
 0x1a7   :  { %1466 = vmatmul.msk.f32.vlgmr.msra.gmra.mxu0 %vm562_vm2, %v555_v49  ;;  %v3355_v49 = vld [vmem:[#allocation8_spill] sm:$0xff] }
 0x1a8   :  { %1041 = vmatpush.msra.mxu0 %v3338_v15  ;;  %v3357_v15 = vld [vmem:[#allocation12_spill] sm:$0xff] }
 0x1aa   :  { %v537_v57 = vpop.f32.mrf.mxu3  ;;  %1042 = vmatpush.msra.mxu0 %v3339_v58  ;;  %v3358_v58 = vld [vmem:[#allocation14_spill] sm:$0xff] }
 0x1ab   :  { %v538_v54 = vadd.f32 %v2543_v51, %v537_v57  ;;  %v2605_v57 = vld [vmem:[%s3159_s6 + $0x18] sm:$0xff] }
 0x1ac   :  { %1043 = vmatpush.msra.mxu0 %v3340_v9  ;;  %707 = vmatpush.msra.mxu2 %v2605_v57  ;;  %v3360_v9 = vld [vmem:[#allocation18_spill] sm:$0xff] }
 0x1ad   :  { %v556_v23 = vmax.f32 %v538_v54, 0.0  ;;  %v3359_v54 = vld [vmem:[#allocation16_spill] sm:$0xff] }
 0x1ae   :  { %1044 = vmatpush.msra.mxu0 %v3341_v13  ;;  %v3362_v13 = vld [vmem:[#allocation24_spill] sm:$0xff] }
 0x1af   :  { %1467 = vmatmul.msk.f32.gmra.mxu0 %vm562_vm2, %v556_v23  ;;  %v3361_v23 = vld [vmem:[#allocation21_spill] sm:$0xff] }
 0x1b0   :  { %1045 = vmatpush.msra.mxu0 %v3342_v14  ;;  %v3363_v14 = vld [vmem:[#allocation27_spill] sm:$0xff] }
 0x1b2   :  { %v540_v60 = vpop.f32.mrf.mxu3  ;;  %1046 = vmatpush.msra.mxu0 %v3343_v7  ;;  %v3365_v7 = vld [vmem:[#allocation33_spill] sm:$0xff] }
 0x1b3   :  { %v541_v10 = vadd.f32 %v2543_v51, %v540_v60  ;;  %v3364_v60 = vld [vmem:[#allocation30_spill] sm:$0xff] }
 0x1b4   :  { %1047 = vmatpush.msra.mxu0 %v3344_v48  ;;  %v3367_v48 = vld [vmem:[#allocation39_spill] sm:$0xff] }
 0x1b5   :  { %v557_v56 = vmax.f32 %v541_v10, 0.0  ;;  %v3366_v10 = vld [vmem:[#allocation36_spill] sm:$0xff] }
 0x1b6   :  { %1048 = vmatpush.msra.mxu0 %v3345_v36  ;;  %v3369_v36 = vld [vmem:[#allocation46_spill] sm:$0xff] }
 0x1b7   :  { %1468 = vmatmul.msk.f32.gmra.mxu0 %vm562_vm2, %v557_v56  ;;  %v3368_v56 = vld [vmem:[#allocation43_spill] sm:$0xff] }
 0x1b8   :  { %1049 = vmatpush.msra.mxu0 %v3346_v40  ;;  %v3370_v40 = vld [vmem:[#allocation49_spill] sm:$0xff] }
 0x1ba   :  { %v543_v31 = vpop.f32.mrf.mxu3  ;;  %1050 = vmatpush.msra.mxu0 %v3347_v32  ;;  %v3372_v32 = vld [vmem:[#allocation55_spill] sm:$0xff] }
 0x1bb   :  { %v544_v24 = vadd.f32 %v2543_v51, %v543_v31  ;;  %v3371_v31 = vld [vmem:[#allocation52_spill] sm:$0xff] }
 0x1bc   :  { %1051 = vmatpush.msra.mxu0 %v3348_v44  ;;  %v3374_v44 = vld [vmem:[#allocation61_spill] sm:$0xff] }
 0x1bd   :  { %v558_v11 = vmax.f32 %v544_v24, 0.0  ;;  %v3373_v24 = vld [vmem:[#allocation58_spill] sm:$0xff] }
 0x1be   :  { %1052 = vmatpush.msra.mxu0 %v3349_v26  ;;  %v3376_v26 = vld [vmem:[#allocation67_spill] sm:$0xff] }
 0x1bf   :  { %1469 = vmatmul.msk.f32.gmra.mxu0 %vm562_vm2, %v558_v11  ;;  %v3375_v11 = vld [vmem:[#allocation64_spill] sm:$0xff] }
 0x1c0   :  { %1053 = vmatpush.msra.mxu0 %v3350_v2  ;;  %v3377_v2 = vld [vmem:[#allocation70_spill] sm:$0xff] }
 0x1c2   :  { %v546_v16 = vpop.f32.mrf.mxu3  ;;  %1054 = vmatpush.msra.mxu0 %v3351_v20  ;;  %v3379_v20 = vld [vmem:[#allocation76_spill] sm:$0xff] }
 0x1c3   :  { %v547_v6 = vadd.f32 %v2543_v51, %v546_v16  ;;  %v3378_v16 = vld [vmem:[#allocation73_spill] sm:$0xff] }
 0x1c4   :  { %1055 = vmatpush.msra.mxu0 %v3352_v28  ;;  %v3381_v28 = vld [vmem:[#allocation81_spill] sm:$0xff] }
 0x1c5   :  { %v559_v42 = vmax.f32 %v547_v6, 0.0  ;;  %v3380_v6 = vld [vmem:[#allocation79_spill] sm:$0xff] }
 0x1c6   :  { %1056 = vmatpush.msra.mxu0 %v3353_v18  ;;  %v2649_v18 = vld [vmem:[%s3159_s6 + $0x8] sm:$0xff] }
 0x1c7   :  { %1470 = vmatmul.msk.f32.gmra.mxu0 %vm562_vm2, %v559_v42  ;;  %v2643_v42 = vld [vmem:[%s3159_s6 + $0x10] sm:$0xff] }
 0x1c8   :  { %708 = vmatpush.msra.mxu2 %v2643_v42 }
 0x1ca   :  { %v549_v45 = vpop.f32.mrf.mxu3  ;;  %709 = vmatpush.msra.mxu2 %v2649_v18 }
 0x1cb   :  { %v550_v52 = vadd.f32 %v2543_v51, %v549_v45  ;;  %v2655_v45 = vld [vmem:[%s3159_s6] sm:$0xff] }
 0x1cc   :  { %710 = vmatpush.msra.mxu2 %v2655_v45 }
 0x1cd   :  { %v560_v55 = vmax.f32 %v550_v52, 0.0  ;;  %v1601_v52 = vld [vmem:[%s3153_s2 + $0x178] sm:$0xff] }
 0x1ce   :  { %965 = vmatpush.msrb.mxu2 %v1601_v52 }
 0x1cf   :  { %1471 = vmatmul.msk.f32.gmra.mxu0 %vm562_vm2, %v560_v55  ;;  %v1602_v55 = vld [vmem:[%s3153_s2 + $0x170] sm:$0xff] }
 0x1d0   :  { %966 = vmatpush.msrb.mxu2 %v1602_v55  ;;  %v3401_v55 = vld [vmem:[#allocation77_spill] sm:$0xff] }
 0x1d2   :  { %v552_v3 = vpop.f32.mrf.mxu3 }
 0x1d3   :  { %v553_v4 = vadd.f32 %v2543_v51, %v552_v3  ;;  %v1603_v3 = vld [vmem:[%s3153_s2 + $0x168] sm:$0xff] }
 0x1d4   :  { %967 = vmatpush.msrb.mxu2 %v1603_v3 }
 0x1d5   :  { %v561_v5 = vmax.f32 %v553_v4, 0.0  ;;  %v1604_v4 = vld [vmem:[%s3153_s2 + $0x160] sm:$0xff] }
 0x1d6   :  { %968 = vmatpush.msrb.mxu2 %v1604_v4  ;;  %v3402_v4 = vld [vmem:[#allocation80_spill] sm:$0xff] }
 0x1d7   :  { %1472 = vmatmul.msk.f32.gmra.mxu0 %vm562_vm2, %v561_v5  ;;  %v1605_v5 = vld [vmem:[%s3153_s2 + $0x158] sm:$0xff] }
 0x1d8   :  { %969 = vmatpush.msrb.mxu2 %v1605_v5 }
 0x224   :  { %v601_v17 = vpop.f32.mrf.mxu0 }
 0x22c   :  { %v604_v19 = vpop.f32.mrf.mxu0 }
 0x234   :  { %v607_v25 = vpop.f32.mrf.mxu0 }
 0x23c   :  { %v610_v27 = vpop.f32.mrf.mxu0 }
 0x244   :  { %v613_v47 = vpop.f32.mrf.mxu0 }
 0x24c   :  { %v616_v63 = vpop.f32.mrf.mxu0 }
 0x254   :  { %v619_v0 = vpop.f32.mrf.mxu0 }
 0x255   :  { %1473 = vmatpush.msk.msra.mxu1 %vm513_vm0, %v619_v0  ;;  %v3382_v0 = vld [vmem:[#allocation20_spill] sm:$0xff] }
 0x257   :  { %638 = vmatpush.msra.mxu1 %v616_v63  ;;  %v1611_v63 = vld [vmem:[%s3153_s2 + $0x128] sm:$0xff] }
 0x259   :  { %639 = vmatpush.msra.mxu1 %v613_v47  ;;  %v1610_v47 = vld [vmem:[%s3153_s2 + $0x130] sm:$0xff] }
 0x25b   :  { %640 = vmatpush.msra.mxu1 %v610_v27  ;;  %v1609_v27 = vld [vmem:[%s3153_s2 + $0x138] sm:$0xff] }
 0x25d   :  { %641 = vmatpush.msra.mxu1 %v607_v25  ;;  %v1608_v25 = vld [vmem:[%s3153_s2 + $0x140] sm:$0xff] }
 0x25f   :  { %642 = vmatpush.msra.mxu1 %v604_v19  ;;  %v1607_v19 = vld [vmem:[%s3153_s2 + $0x148] sm:$0xff] }
 0x261   :  { %643 = vmatpush.msra.mxu1 %v601_v17  ;;  %v1606_v17 = vld [vmem:[%s3153_s2 + $0x150] sm:$0xff] }
 0x262   :  { %1474 = vmatmul.msk.f32.vlgmr.msra.gmra.mxu1 %vm491_vm1, %v2434_v34  ;;  %970 = vmatpush.msrb.mxu2 %v1606_v17 }
 0x263   :  { %927 = vmatpush.msrb.mxu1 %v1597_v35  ;;  %v2695_v35 = vld [vmem:[%s3158_s5] ss:$0 sm:$0xff] }
 0x264   :  { %971 = vmatpush.msrb.mxu2 %v1607_v19 }
 0x265   :  { %928 = vmatpush.msrb.mxu1 %v1598_v61  ;;  %v3383_v61 = vld [vmem:[#allocation23_spill] sm:$0xff] }
 0x266   :  { %972 = vmatpush.msrb.mxu2 %v1608_v25 }
 0x267   :  { %929 = vmatpush.msrb.mxu1 %v1599_v8  ;;  %v3384_v8 = vld [vmem:[#allocation26_spill] sm:$0xff] }
 0x268   :  { %973 = vmatpush.msrb.mxu2 %v1609_v27 }
 0x269   :  { %930 = vmatpush.msrb.mxu1 %v1600_v59 }
 0x26a   :  { %1475 = vmatmul.msk.f32.gmra.mxu1 %vm491_vm1, %v2441_v30  ;;  %974 = vmatpush.msrb.mxu2 %v1610_v47 }
 0x26b   :  { %931 = vmatpush.msrb.mxu1 %v3354_v62 }
 0x26c   :  { %975 = vmatpush.msrb.mxu2 %v1611_v63 }
 0x26d   :  { %932 = vmatpush.msrb.mxu1 %v3355_v49  ;;  %v3385_v49 = vld [vmem:[#allocation29_spill] sm:$0xff] }
 0x26e   :  { %976 = vmatpush.msrb.mxu2 %v3382_v0 }
 0x26f   :  { %933 = vmatpush.msrb.mxu1 %v3356_v41 }
 0x270   :  { %977 = vmatpush.msrb.mxu2 %v3383_v61 }
 0x271   :  { %934 = vmatpush.msrb.mxu1 %v3357_v15  ;;  %v3386_v15 = vld [vmem:[#allocation32_spill] sm:$0xff] }
 0x272   :  { %1476 = vmatmul.msk.f32.gmra.mxu1 %vm491_vm1, %v2448_v22  ;;  %978 = vmatpush.msrb.mxu2 %v3384_v8 }
 0x273   :  { %935 = vmatpush.msrb.mxu1 %v3358_v58  ;;  %v3387_v58 = vld [vmem:[#allocation35_spill] sm:$0xff] }
 0x274   :  { %979 = vmatpush.msrb.mxu2 %v3385_v49  ;;  %v1496_v49 = vld [vmem:[%s3154_s0 + $0x188] sm:$0xff] }
 0x275   :  { %936 = vmatpush.msrb.mxu1 %v3359_v54  ;;  %905 = vmatmul.f32.vlgmr.msrb.gmra.mxu0 %v1496_v49  ;;  %v1529_v49 = vld [vmem:[%s3154_s0 + $0x290] sm:$0xff] }
 0x276   :  { %980 = vmatpush.msrb.mxu2 %v3386_v15  ;;  %v1505_v15 = vld [vmem:[%s3154_s0 + $0x1d0] sm:$0xff]  ;;  %1253 = vmatpush.msrb.mxu0 %v2455_v38  ;;  %v159_v38 = vld [vmem:[%s3160_s8] sm:$0xff] }
 0x277   :  { %937 = vmatpush.msrb.mxu1 %v3360_v9  ;;  %v3388_v9 = vld [vmem:[#allocation38_spill] sm:$0xff] }
 0x278   :  { %1254 = vmatpush.msrb.mxu0 %v2460_v46  ;;  %v1512_v46 = vld [vmem:[%s3154_s0 + $0x208] sm:$0xff] }
 0x279   :  { %938 = vmatpush.msrb.mxu1 %v3361_v23 }
 0x27a   :  { %1477 = vmatmul.msk.f32.gmra.mxu1 %vm491_vm1, %v2477_v1  ;;  %1255 = vmatpush.msrb.mxu0 %v2466_v50  ;;  %v1510_v50 = vld [vmem:[%s3154_s0 + $0x1f8] sm:$0xff] }
 0x27b   :  { %939 = vmatpush.msrb.mxu1 %v3362_v13  ;;  %v3389_v13 = vld [vmem:[#allocation41_spill] sm:$0xff] }
 0x27c   :  { %1256 = vmatpush.msrb.mxu0 %v2472_v53  ;;  %v160_v53 = vld [vmem:[%s3160_s8 + $0x8] sm:$0xff] }
 0x27d   :  { %940 = vmatpush.msrb.mxu1 %v3363_v14 }
 0x27e   :  { %1257 = vmatpush.msrb.mxu0 %v2483_v12  ;;  %v1519_v12 = vld [vmem:[%s3154_s0 + $0x240] sm:$0xff] }
 0x27f   :  { %941 = vmatpush.msrb.mxu1 %v3364_v60  ;;  %v3390_v60 = vld [vmem:[#allocation44_spill] sm:$0xff] }
 0x280   :  { %1258 = vmatpush.msrb.mxu0 %v2513_v37  ;;  %v1517_v37 = vld [vmem:[%s3154_s0 + $0x230] sm:$0xff] }
 0x281   :  { %942 = vmatpush.msrb.mxu1 %v3365_v7  ;;  %v3391_v7 = vld [vmem:[#allocation47_spill] sm:$0xff] }
 0x282   :  { %1478 = vmatmul.msk.f32.gmra.mxu1 %vm491_vm1, %v2492_v21  ;;  %1259 = vmatpush.msrb.mxu0 %v2519_v39  ;;  %v161_v39 = vld [vmem:[%s3160_s8 + $0x10] sm:$0xff] }
 0x283   :  { %1079 = vmatpush.msra.mxu1 %v3366_v10 }
 0x284   :  { %1260 = vmatpush.msrb.mxu0 %v2525_v43  ;;  %v1526_v43 = vld [vmem:[%s3154_s0 + $0x278] sm:$0xff] }
 0x285   :  { %1080 = vmatpush.msra.mxu1 %v3367_v48  ;;  %v3392_v48 = vld [vmem:[#allocation50_spill] sm:$0xff] }
 0x287   :  { %1081 = vmatpush.msra.mxu1 %v3368_v56 }
 0x289   :  { %1082 = vmatpush.msra.mxu1 %v3369_v36  ;;  %v3393_v36 = vld [vmem:[#allocation53_spill] sm:$0xff] }
 0x28a   :  { %1479 = vmatmul.msk.f32.gmra.mxu1 %vm491_vm1, %v2499_v29 }
 0x28b   :  { %1083 = vmatpush.msra.mxu1 %v3370_v40 }
 0x28d   :  { %1084 = vmatpush.msra.mxu1 %v3371_v31  ;;  %v3394_v31 = vld [vmem:[#allocation56_spill] sm:$0xff] }
 0x28f   :  { %1085 = vmatpush.msra.mxu1 %v3372_v32  ;;  %v3395_v32 = vld [vmem:[#allocation59_spill] sm:$0xff] }
 0x291   :  { %1086 = vmatpush.msra.mxu1 %v3373_v24 }
 0x292   :  { %1480 = vmatmul.msk.f32.gmra.mxu1 %vm491_vm1, %v2506_v33 }
 0x293   :  { %1087 = vmatpush.msra.mxu1 %v3374_v44  ;;  %v3396_v44 = vld [vmem:[#allocation62_spill] sm:$0xff] }
 0x295   :  { %1088 = vmatpush.msra.mxu1 %v3375_v11 }
 0x297   :  { %1089 = vmatpush.msra.mxu1 %v3376_v26  ;;  %v3397_v26 = vld [vmem:[#allocation65_spill] sm:$0xff] }
 0x299   :  { %1090 = vmatpush.msra.mxu1 %v3377_v2 }
 0x29b   :  { %1091 = vmatpush.msra.mxu1 %v3378_v16  ;;  %v3398_v16 = vld [vmem:[#allocation68_spill] sm:$0xff] }
 0x29d   :  { %1092 = vmatpush.msra.mxu1 %v3379_v20  ;;  %v3399_v20 = vld [vmem:[#allocation71_spill] sm:$0xff] }
 0x29f   :  { %1093 = vmatpush.msra.mxu1 %v3380_v6 }
 0x2a1   :  { %1094 = vmatpush.msra.mxu1 %v3381_v28  ;;  %v3400_v28 = vld [vmem:[#allocation74_spill] sm:$0xff] }
 0x2df   :  { %v645_v59 = vpop.f32.mrf.mxu1 }
 0x2e0   :  { %v646_v62 = vadd.f32 %v2695_v35, %v645_v59  ;;  %v1498_v59 = vld [vmem:[%s3154_s0 + $0x198] sm:$0xff] }
 0x2e2   :  { %v666_v41 = vmax.f32 %v646_v62, 0.0 }
 0x2e4   :  { %1481 = vmatmul.msk.f32.vlgmr.msra.gmra.mxu2 %vm673_vm3, %v666_v41  ;;  %v1497_v41 = vld [vmem:[%s3154_s0 + $0x190] sm:$0xff] }
 0x2e5   :  { %1117 = vmatpush.msra.mxu2 %v3387_v58  ;;  %943 = vmatmul.f32.vlgmr.msrb.gmra.mxu1 %v1497_v41  ;;  %v1504_v58 = vld [vmem:[%s3154_s0 + $0x1c8] sm:$0xff]  ;;  %v1537_v41 = vld [vmem:[%s3154_s0 + $0x2d0] sm:$0xff] }
 0x2e7   :  { %v648_v54 = vpop.f32.mrf.mxu1  ;;  %1118 = vmatpush.msra.mxu2 %v3388_v9  ;;  %v1518_v9 = vld [vmem:[%s3154_s0 + $0x238] sm:$0xff] }
 0x2e8   :  { %v649_v23 = vadd.f32 %v2695_v35, %v648_v54  ;;  %v1511_v54 = vld [vmem:[%s3154_s0 + $0x200] sm:$0xff] }
 0x2e9   :  { %1119 = vmatpush.msra.mxu2 %v3389_v13  ;;  %v1614_v13 = vld [vmem:[%s3153_s2 + $0x1e8] sm:$0xff] }
 0x2ea   :  { %v667_v14 = vmax.f32 %v649_v23, 0.0  ;;  %v1612_v23 = vld [vmem:[%s3153_s2 + $0x1f8] sm:$0xff] }
 0x2eb   :  { %1120 = vmatpush.msra.mxu2 %v3390_v60  ;;  %v1524_v60 = vld [vmem:[%s3154_s0 + $0x268] sm:$0xff] }
 0x2ec   :  { %1482 = vmatmul.msk.f32.gmra.mxu2 %vm673_vm3, %v667_v14  ;;  %v1615_v14 = vld [vmem:[%s3153_s2 + $0x1e0] sm:$0xff] }
 0x2ed   :  { %1121 = vmatpush.msra.mxu2 %v3391_v7  ;;  %946 = vmatmul.f32.gmra.mxu1 %v1504_v58  ;;  %v1525_v7 = vld [vmem:[%s3154_s0 + $0x270] sm:$0xff]  ;;  %v1520_v58 = vld [vmem:[%s3154_s0 + $0x248] sm:$0xff] }
 0x2ef   :  { %v651_v10 = vpop.f32.mrf.mxu1  ;;  %1122 = vmatpush.msra.mxu2 %v3392_v48  ;;  %v1533_v48 = vld [vmem:[%s3154_s0 + $0x2b0] sm:$0xff] }
 0x2f0   :  { %v652_v56 = vadd.f32 %v2695_v35, %v651_v10  ;;  %v162_v10 = vld [vmem:[%s3160_s8 + $0x18] sm:$0xff] }
 0x2f1   :  { %1123 = vmatpush.msra.mxu2 %v3393_v36  ;;  %v1618_v36 = vld [vmem:[%s3153_s2 + $0x1c8] sm:$0xff] }
 0x2f2   :  { %v668_v40 = vmax.f32 %v652_v56, 0.0  ;;  %v1616_v56 = vld [vmem:[%s3153_s2 + $0x1d8] sm:$0xff] }
 0x2f3   :  { %1124 = vmatpush.msra.mxu2 %v3394_v31  ;;  %v1531_v31 = vld [vmem:[%s3154_s0 + $0x2a0] sm:$0xff] }
 0x2f4   :  { %1483 = vmatmul.msk.f32.gmra.mxu2 %vm673_vm3, %v668_v40  ;;  %v1619_v40 = vld [vmem:[%s3153_s2 + $0x1c0] sm:$0xff] }
 0x2f5   :  { %1125 = vmatpush.msra.mxu2 %v3395_v32  ;;  %949 = vmatmul.f32.gmra.mxu1 %v1511_v54  ;;  %v1532_v32 = vld [vmem:[%s3154_s0 + $0x2a8] sm:$0xff] }
 0x2f7   :  { %v654_v24 = vpop.f32.mrf.mxu1  ;;  %1126 = vmatpush.msra.mxu2 %v3396_v44  ;;  %v1620_v44 = vld [vmem:[%s3153_s2 + $0x1b8] sm:$0xff] }
 0x2f8   :  { %v655_v11 = vadd.f32 %v2695_v35, %v654_v24  ;;  %v1540_v24 = vld [vmem:[%s3154_s0 + $0x2e8] sm:$0x3] }
 0x2f9   :  { %1127 = vmatpush.msra.mxu2 %v3397_v26  ;;  %v1538_v26 = vld [vmem:[%s3154_s0 + $0x2d8] sm:$0x3] }
 0x2fa   :  { %v669_v2 = vmax.f32 %v655_v11, 0.0  ;;  %v1621_v11 = vld [vmem:[%s3153_s2 + $0x1b0] sm:$0xff] }
 0x2fb   :  { %1128 = vmatpush.msra.mxu2 %v3398_v16  ;;  %v1623_v16 = vld [vmem:[%s3153_s2 + $0x1a0] sm:$0xff] }
 0x2fc   :  { %1484 = vmatmul.msk.f32.gmra.mxu2 %vm673_vm3, %v669_v2  ;;  %v1539_v2 = vld [vmem:[%s3154_s0 + $0x2e0] sm:$0x3] }
 0x2fd   :  { %1129 = vmatpush.msra.mxu2 %v3399_v20  ;;  %952 = vmatmul.f32.gmra.mxu1 %v1518_v9  ;;  %v1502_v20 = vld [vmem:[%s3154_s0 + $0x1b8] sm:$0xff] }
 0x2ff   :  { %v657_v6 = vpop.f32.mrf.mxu1  ;;  %1130 = vmatpush.msra.mxu2 %v3400_v28  ;;  %v1625_v28 = vld [vmem:[%s3153_s2 + $0x190] sm:$0xff] }
 0x300   :  { %v658_v52 = vadd.f32 %v2695_v35, %v657_v6  ;;  %v1624_v6 = vld [vmem:[%s3153_s2 + $0x198] sm:$0xff] }
 0x301   :  { %1131 = vmatpush.msra.mxu2 %v3401_v55  ;;  %v1500_v55 = vld [vmem:[%s3154_s0 + $0x1a8] sm:$0xff] }
 0x302   :  { %v670_v3 = vmax.f32 %v658_v52, 0.0  ;;  %v1627_v52 = vld [vmem:[%s3153_s2 + $0x180] sm:$0xff] }
 0x303   :  { %1132 = vmatpush.msra.mxu2 %v3402_v4  ;;  %v1501_v4 = vld [vmem:[%s3154_s0 + $0x1b0] sm:$0xff] }
 0x304   :  { %1485 = vmatmul.msk.f32.gmra.mxu2 %vm673_vm3, %v670_v3  ;;  %v165_v3 = vld [vmem:[%s3160_s8 + $0x30] sm:$0x3] }
 0x305   :  { %955 = vmatmul.f32.gmra.mxu1 %v1525_v7 }
 0x307   :  { %v660_v5 = vpop.f32.mrf.mxu1 }
 0x308   :  { %v661_v17 = vadd.f32 %v2695_v35, %v660_v5  ;;  %v1509_v5 = vld [vmem:[%s3154_s0 + $0x1f0] sm:$0xff] }
 0x30a   :  { %v671_v19 = vmax.f32 %v661_v17, 0.0  ;;  %v163_v17 = vld [vmem:[%s3160_s8 + $0x20] sm:$0xff] }
 0x30c   :  { %1486 = vmatmul.msk.f32.gmra.mxu2 %vm673_vm3, %v671_v19  ;;  %v1508_v19 = vld [vmem:[%s3154_s0 + $0x1e8] sm:$0xff] }
 0x30d   :  { %958 = vmatmul.f32.gmra.mxu1 %v1532_v32 }
 0x30f   :  { %v663_v25 = vpop.f32.mrf.mxu1 }
 0x310   :  { %v664_v27 = vadd.f32 %v2695_v35, %v663_v25  ;;  %v1516_v25 = vld [vmem:[%s3154_s0 + $0x228] sm:$0xff] }
 0x312   :  { %v672_v47 = vmax.f32 %v664_v27, 0.0  ;;  %v164_v27 = vld [vmem:[%s3160_s8 + $0x28] sm:$0xff] }
 0x314   :  { %1487 = vmatmul.msk.f32.gmra.mxu2 %vm673_vm3, %v672_v47  ;;  %v1515_v47 = vld [vmem:[%s3154_s0 + $0x220] sm:$0xff] }
 0x315   :  { %961 = vmatmul.f32.gmra.mxu1 %v1539_v2 }
 0x31c   :  { %981 = vmatmul.f32.vlgmr.msrb.gmra.mxu2 %v1498_v59  ;;  %v1506_v59 = vld [vmem:[%s3154_s0 + $0x1d8] sm:$0xff] }
 0x31d   :  { %1364 = vmatpush.msrb.mxu2 %v2605_v57  ;;  %v1629_v57 = vmov 0   ;;  %1095 = vmatmul.f32.vlgmr.msra.gmra.mxu1 %v1501_v4 }
 0x31e   :  { %1592 = vset.pattern.permute.xlu0 %v1629_v57  ;;  %1593 = vset.pattern.permute.xlu1 %v1629_v57 }
 0x31f   :  { %1365 = vmatpush.msrb.mxu2 %v2643_v42  ;;  %1594 = vset.pattern.permute.xlu2 %v1629_v57  ;;  %v1535_v57 = vld [vmem:[%s3154_s0 + $0x2c0] sm:$0xff] }
 0x320   :  { %776 = vperm.xlu0 %1592, %v159_v38   ;;  %786 = vperm.xlu1 %1593, %v161_v39   ;;  %v1542_v38 = vld [vmem:[%s3154_s0 + $0x2f8] sm:$0x3] }
 0x321   :  { %1366 = vmatpush.msrb.mxu2 %v2649_v18  ;;  %v1503_v18 = vld [vmem:[%s3154_s0 + $0x1c0] sm:$0xff]  ;;  %796 = vperm.xlu2 %1594, %v163_v17  }
 0x322   :  { %908 = vmatmul.f32.gmra.mxu0 %v1503_v18  ;;  %v1544_v18 = vld [vmem:[%s3154_s0 + $0x308] sm:$0x3] }
 0x323   :  { %1367 = vmatpush.msrb.mxu2 %v2655_v45 }
 0x324   :  { %984 = vmatmul.f32.gmra.mxu2 %v1505_v15  ;;  %v1513_v15 = vld [vmem:[%s3154_s0 + $0x210] sm:$0xff] }
 0x325   :  { %1098 = vmatmul.f32.gmra.mxu1 %v1508_v19 }
 0x328   :  { %781 = vperm.xlu0 %1592, %v160_v53   ;;  %791 = vperm.xlu1 %1593, %v162_v10   ;;  %v1541_v53 = vld [vmem:[%s3154_s0 + $0x2f0] sm:$0x3] }
 0x329   :  { %801 = vperm.xlu2 %1594, %v164_v27  }
 0x32a   :  { %911 = vmatmul.f32.gmra.mxu0 %v1510_v50  ;;  %v1534_v50 = vld [vmem:[%s3154_s0 + $0x2b8] sm:$0xff] }
 0x32c   :  { %987 = vmatmul.f32.gmra.mxu2 %v1512_v46  ;;  %v1543_v46 = vld [vmem:[%s3154_s0 + $0x300] sm:$0x3] }
 0x32d   :  { %1101 = vmatmul.f32.gmra.mxu1 %v1515_v47 }
 0x330   :  { %806 = vperm.xlu0 %1592, %v165_v3  }
 0x332   :  { %914 = vmatmul.f32.gmra.mxu0 %v1517_v37 }
 0x334   :  { %990 = vmatmul.f32.gmra.mxu2 %v1519_v12  ;;  %v906_v12 = vpop.f32.mrf.mxu0 }
 0x33a   :  { %917 = vmatmul.f32.gmra.mxu0 %v1524_v60 }
 0x33c   :  { %993 = vmatmul.f32.gmra.mxu2 %v1526_v43 }
 0x342   :  { %920 = vmatmul.f32.gmra.mxu0 %v1531_v31 }
 0x344   :  { %996 = vmatmul.f32.gmra.mxu2 %v1533_v48 }
 0x34a   :  { %923 = vmatmul.f32.gmra.mxu0 %v1538_v26 }
 0x34c   :  { %999 = vmatmul.f32.gmra.mxu2 %v1540_v24 }
 0x352   :  { %1057 = vmatmul.f32.vlgmr.msra.gmra.mxu0 %v1500_v55 }
 0x354   :  { %1133 = vmatmul.f32.vlgmr.msra.gmra.mxu2 %v1502_v20 }
 0x35c   :  { %1136 = vmatmul.f32.gmra.mxu2 %v1509_v5 }
 0x362   :  { %v944_v37 = vpop.f32.mrf.mxu1 }
 0x363   :  { %v945_v9 = vadd.f32 %v944_v37, %v906_v12 }
 0x364   :  { %1139 = vmatmul.f32.gmra.mxu2 %v1516_v25 }
 0x367   :  { %v712_v63 = vpop.f32.mrf.mxu2 }
 0x36f   :  { %v715_v0 = vpop.f32.mrf.mxu2 }
 0x377   :  { %v718_v61 = vpop.f32.mrf.mxu2 }
 0x37b   :  { %v2988_v5 = vpop.permute.xlu2 %796 }
 0x37f   :  { %v721_v8 = vpop.f32.mrf.mxu2 }
 0x387   :  { %v724_v62 = vpop.f32.mrf.mxu2 }
 0x38f   :  { %v727_v42 = vpop.f32.mrf.mxu2 }
 0x392   :  { %v2986_v55 = vpop.permute.xlu1 %786 }
 0x397   :  { %v730_v45 = vpop.f32.mrf.mxu2 }
 0x398   :  { %1488 = vmatpush.msk.msra.mxu3 %vm513_vm0, %v730_v45  ;;  %v1527_v45 = vld [vmem:[%s3154_s0 + $0x280] sm:$0xff] }
 0x39a   :  { %746 = vmatpush.msra.mxu3 %v727_v42  ;;  %v1536_v42 = vld [vmem:[%s3154_s0 + $0x2c8] sm:$0xff] }
 0x39c   :  { %747 = vmatpush.msra.mxu3 %v724_v62  ;;  %v1528_v62 = vld [vmem:[%s3154_s0 + $0x288] sm:$0xff] }
 0x39e   :  { %748 = vmatpush.msra.mxu3 %v721_v8  ;;  %v1530_v8 = vld [vmem:[%s3154_s0 + $0x298] sm:$0xff] }
 0x39f   :  { %v982_v54 = vpop.f32.mrf.mxu2  ;;  %v909_v43 = vpop.f32.mrf.mxu0 }
 0x3a0   :  { %749 = vmatpush.msra.mxu3 %v718_v61  ;;  %v1522_v61 = vld [vmem:[%s3154_s0 + $0x258] sm:$0xff]  ;;  %v2974_v39 = vadd.f32 %v982_v54, %v945_v9 }
 0x3a1   :  { %1104 = vmatmul.f32.gmra.mxu1 %v1522_v61 }
 0x3a2   :  { %750 = vmatpush.msra.mxu3 %v715_v0  ;;  %v1521_v0 = vld [vmem:[%s3154_s0 + $0x250] sm:$0xff] }
 0x3a4   :  { %751 = vmatpush.msra.mxu3 %v712_v63  ;;  %v1523_v63 = vld [vmem:[%s3154_s0 + $0x260] sm:$0xff] }
 0x3a5   :  { %1489 = vmatmul.msk.f32.vlgmr.msra.gmra.mxu3 %vm491_vm1, %v2434_v34  ;;  %v1613_v34 = vld [vmem:[%s3153_s2 + $0x1f0] sm:$0xff]  ;;  %1142 = vmatmul.f32.gmra.mxu2 %v1523_v63 }
 0x3a6   :  { %1003 = vmatpush.msrb.mxu3 %v1612_v23  ;;  %v947_v23 = vpop.f32.mrf.mxu1 }
 0x3a7   :  { %v912_v60 = vpop.f32.mrf.mxu0 }
 0x3a8   :  { %1004 = vmatpush.msrb.mxu3 %v1613_v34  ;;  %v948_v34 = vadd.f32 %v947_v23, %v909_v43 }
 0x3a9   :  { %1107 = vmatmul.f32.gmra.mxu1 %v1529_v49 }
 0x3aa   :  { %1005 = vmatpush.msrb.mxu3 %v1614_v13  ;;  %v985_v13 = vpop.f32.mrf.mxu2 }
 0x3ac   :  { %1006 = vmatpush.msrb.mxu3 %v1615_v14  ;;  %v2976_v14 = vadd.f32 %v985_v13, %v948_v34 }
 0x3ad   :  { %1490 = vmatmul.msk.f32.gmra.mxu3 %vm491_vm1, %v2441_v30  ;;  %v1617_v30 = vld [vmem:[%s3153_s2 + $0x1d0] sm:$0xff]  ;;  %1145 = vmatmul.f32.gmra.mxu2 %v1530_v8  ;;  %v2998_v8 = vpop.permute.xlu2 %801 }
 0x3ae   :  { %1007 = vmatpush.msrb.mxu3 %v1616_v56  ;;  %v950_v7 = vpop.f32.mrf.mxu1 }
 0x3af   :  { %v951_v10 = vadd.f32 %v950_v7, %v912_v60  ;;  %v3017_v7 = vld [vmem:[%s3161_s7] sm:$0x1] }
 0x3b0   :  { %1008 = vmatpush.msrb.mxu3 %v1617_v30  ;;  %v915_v30 = vpop.f32.mrf.mxu0 }
 0x3b1   :  { %1110 = vmatmul.f32.gmra.mxu1 %v1536_v42 }
 0x3b2   :  { %1009 = vmatpush.msrb.mxu3 %v1618_v36  ;;  %v988_v48 = vpop.f32.mrf.mxu2 }
 0x3b3   :  { %v2978_v56 = vadd.f32 %v988_v48, %v951_v10 }
 0x3b4   :  { %1010 = vmatpush.msrb.mxu3 %v1619_v40 }
 0x3b5   :  { %1491 = vmatmul.msk.f32.gmra.mxu3 %vm491_vm1, %v2448_v22  ;;  %v1622_v22 = vld [vmem:[%s3153_s2 + $0x1a8] sm:$0xff]  ;;  %1148 = vmatmul.f32.gmra.mxu2 %v1537_v41 }
 0x3b6   :  { %1011 = vmatpush.msrb.mxu3 %v1620_v44  ;;  %v953_v36 = vpop.f32.mrf.mxu1 }
 0x3b7   :  { %v954_v31 = vadd.f32 %v953_v36, %v915_v30 }
 0x3b8   :  { %1012 = vmatpush.msrb.mxu3 %v1621_v11  ;;  %v918_v44 = vpop.f32.mrf.mxu0 }
 0x3b9   :  { %1113 = vmatmul.f32.gmra.mxu1 %v1543_v46 }
 0x3ba   :  { %1013 = vmatpush.msrb.mxu3 %v1622_v22  ;;  %v991_v40 = vpop.f32.mrf.mxu2 }
 0x3bb   :  { %v2980_v32 = vadd.f32 %v991_v40, %v954_v31 }
 0x3bc   :  { %1014 = vmatpush.msrb.mxu3 %v1623_v16 }
 0x3bd   :  { %1492 = vmatmul.msk.f32.gmra.mxu3 %vm491_vm1, %v2477_v1  ;;  %v1626_v1 = vld [vmem:[%s3153_s2 + $0x188] sm:$0xff]  ;;  %1151 = vmatmul.f32.gmra.mxu2 %v1544_v18 }
 0x3be   :  { %1015 = vmatpush.msrb.mxu3 %v1624_v6  ;;  %v956_v11 = vpop.f32.mrf.mxu1 }
 0x3bf   :  { %v957_v26 = vadd.f32 %v956_v11, %v918_v44 }
 0x3c0   :  { %1016 = vmatpush.msrb.mxu3 %v1625_v28  ;;  %v921_v28 = vpop.f32.mrf.mxu0 }
 0x3c2   :  { %1017 = vmatpush.msrb.mxu3 %v1626_v1  ;;  %v994_v22 = vpop.f32.mrf.mxu2  ;;  %v2984_v1 = vpop.permute.xlu0 %776 }
 0x3c3   :  { %v2982_v2 = vadd.f32 %v994_v22, %v957_v26 }
 0x3c4   :  { %1018 = vmatpush.msrb.mxu3 %v1627_v52 }
 0x3c5   :  { %1493 = vmatmul.msk.f32.gmra.mxu3 %vm491_vm1, %v2492_v21  ;;  %v1507_v21 = vld [vmem:[%s3154_s0 + $0x1e0] sm:$0xff] }
 0x3c6   :  { %1060 = vmatmul.f32.gmra.mxu0 %v1507_v21  ;;  %v959_v52 = vpop.f32.mrf.mxu1 }
 0x3c8   :  { %v924_v21 = vpop.f32.mrf.mxu0 }
 0x3ca   :  { %v997_v3 = vpop.f32.mrf.mxu2  ;;  %v2990_v17 = vpop.permute.xlu0 %781 }
 0x3cd   :  { %1494 = vmatmul.msk.f32.gmra.mxu3 %vm491_vm1, %v2499_v29  ;;  %v1514_v29 = vld [vmem:[%s3154_s0 + $0x218] sm:$0xff] }
 0x3ce   :  { %1063 = vmatmul.f32.gmra.mxu0 %v1514_v29  ;;  %v962_v25 = vpop.f32.mrf.mxu1  ;;  %v2993_v29 = vpop.permute.xlu1 %791 }
 0x3d0   :  { %v3001_v49 = vpop.f32.mrf.mxu0 }
 0x3d5   :  { %1495 = vmatmul.msk.f32.gmra.mxu3 %vm491_vm1, %v2506_v33  ;;  %v1499_v33 = vld [vmem:[%s3154_s0 + $0x1a0] sm:$0xff] }
 0x3d6   :  { %1066 = vmatmul.f32.gmra.mxu0 %v1521_v0  ;;  %v3006_v42 = vpop.f32.mrf.mxu1 }
 0x3dd   :  { %1019 = vmatmul.f32.vlgmr.msrb.gmra.mxu3 %v1499_v33  ;;  %v1000_v33 = vpop.f32.mrf.mxu2 }
 0x3de   :  { %1069 = vmatmul.f32.gmra.mxu0 %v1528_v62  ;;  %v1099_v43 = vpop.f32.mrf.mxu1 }
 0x3e5   :  { %1022 = vmatmul.f32.gmra.mxu3 %v1506_v59 }
 0x3e6   :  { %1072 = vmatmul.f32.gmra.mxu0 %v1535_v57  ;;  %v3004_v57 = vpop.permute.xlu0 %806  ;;  %v1102_v40 = vpop.f32.mrf.mxu1 }
 0x3ed   :  { %1025 = vmatmul.f32.gmra.mxu3 %v1513_v15 }
 0x3ee   :  { %1075 = vmatmul.f32.gmra.mxu0 %v1542_v38  ;;  %v3008_v38 = vpop.f32.mrf.mxu2 }
 0x3f5   :  { %1028 = vmatmul.f32.gmra.mxu3 %v1520_v58 }
 0x3f6   :  { %v3012_v34 = vpop.f32.mrf.mxu2 }
 0x3fd   :  { %1031 = vmatmul.f32.gmra.mxu3 %v1527_v45 }
 0x3fe   :  { %v1140_v31 = vpop.f32.mrf.mxu2 }
 0x405   :  { %1034 = vmatmul.f32.gmra.mxu3 %v1534_v50 }
 0x40d   :  { %1037 = vmatmul.f32.gmra.mxu3 %v1541_v53 }
 0x41e   :  { %v1105_v11 = vpop.f32.mrf.mxu1 }
 0x428   :  { %v753_v24 = vpop.f32.mrf.mxu3  ;;  %v1143_v22 = vpop.f32.mrf.mxu2 }
 0x429   :  { %v809_v27 = vmul.f32 %v2984_v1, %v753_v24 }
 0x430   :  { %v756_v16 = vpop.f32.mrf.mxu3 }
 0x431   :  { %v810_v19 = vmul.f32 %v2990_v17, %v756_v16 }
 0x433   :  { %v816_v0 = vadd.f32 %v810_v19, %v809_v27  ;;  %v960_v27 = vadd.f32 %v959_v52, %v921_v28 }
 0x438   :  { %v759_v20 = vpop.f32.mrf.mxu3 }
 0x439   :  { %v811_v47 = vmul.f32 %v2986_v55, %v759_v20  ;;  %v1108_v20 = vpop.f32.mrf.mxu1 }
 0x43b   :  { %v817_v59 = vadd.f32 %v816_v0, %v811_v47 }
 0x440   :  { %v762_v6 = vpop.f32.mrf.mxu3 }
 0x441   :  { %v812_v61 = vmul.f32 %v2993_v29, %v762_v6 }
 0x443   :  { %v818_v41 = vadd.f32 %v817_v59, %v812_v61  ;;  %v1061_v12 = vpop.f32.mrf.mxu0  ;;  %v998_v61 = vadd.f32 %v997_v3, %v960_v27  ;;  %v963_v59 = vadd.f32 %v962_v25, %v924_v21 }
 0x448   :  { %v765_v4 = vpop.f32.mrf.mxu3 }
 0x449   :  { %v813_v62 = vmul.f32 %v2988_v5, %v765_v4  ;;  %v1146_v4 = vpop.f32.mrf.mxu2 }
 0x44b   :  { %v819_v18 = vadd.f32 %v818_v41, %v813_v62  ;;  %v1064_v30 = vpop.f32.mrf.mxu0  ;;  %v1001_v41 = vadd.f32 %v1000_v33, %v963_v59 }
 0x450   :  { %v768_v63 = vpop.f32.mrf.mxu3 }
 0x451   :  { %v814_v15 = vmul.f32 %v2998_v8, %v768_v63  ;;  %v1111_v63 = vpop.f32.mrf.mxu1  ;;  %v1149_v0 = vpop.f32.mrf.mxu2 }
 0x453   :  { %v820_v45 = vadd.f32 %v819_v18, %v814_v15  ;;  %v1067_v44 = vpop.f32.mrf.mxu0 }
 0x458   :  { %v771_v58 = vpop.f32.mrf.mxu3 }
 0x459   :  { %v815_v46 = vmul.f32 %v3004_v57, %v771_v58  ;;  %v1152_v52 = vpop.f32.mrf.mxu2 }
 0x45b   :  { %v821_v50 = vsel %vm513_vm0, %v815_v46, 0.0  ;;  %v1070_v16 = vpop.f32.mrf.mxu0 }
 0x45c   :  { %v822_v54 = vadd.f32 %v821_v50, %v820_v45 }
 0x45e   :  { %v823_v53 = vrot.slane %v822_v54, 4 }
 0x460   :  { %v824_v37 = vadd.f32 %v823_v53, %v822_v54  ;;  %v1020_v9 = vpop.f32.mrf.mxu3  ;;  %v1114_v54 = vpop.f32.mrf.mxu1 }
 0x461   :  { %v1021_v33 = vadd.f32 %v1020_v9, %v2974_v39  ;;  %v3057_v9 = vld [vmem:[%s3156_s1 + $0x50] sm:$0xff] }
 0x462   :  { %v825_v23 = vrot.slane %v824_v37, 2 }
 0x463   :  { %v1073_v19 = vpop.f32.mrf.mxu0 }
 0x464   :  { %v826_v13 = vadd.f32 %v825_v23, %v824_v37 }
 0x466   :  { %v827_v60 = vrot.slane %v826_v13, 1 }
 0x468   :  { %v828_v10 = vadd.f32 %v827_v60, %v826_v13  ;;  %v1023_v48 = vpop.f32.mrf.mxu3 }
 0x469   :  { %v1024_v23 = vadd.f32 %v1023_v48, %v2976_v14 }
 0x46a   :  { %v829_v36 = vadd.f32 %v828_v10, %v3017_v7 }
 0x46b   :  { %v1076_v58 = vpop.f32.mrf.mxu0  ;;  %v1062_v10 = vadd.f32 %v1061_v12, %v1024_v23 }
 0x46c   :  { %830 = vst [vmem:[%s3162_s9] sm:$0x1] %v829_v36 }
 0x470   :  { %v1026_v24 = vpop.f32.mrf.mxu3 }
 0x471   :  { %v1027_v53 = vadd.f32 %v1026_v24, %v2978_v56  ;;  %v1059_v56 = vadd.f32 %v3001_v49, %v1021_v33  ;;  %v3036_v49 = vld [vmem:[%s3156_s1 + $0x38] sm:$0xff] }
 0x473   :  { %v1097_v48 = vadd.f32 %v3006_v42, %v1059_v56  ;;  %v3043_v42 = vld [vmem:[%s3156_s1 + $0x40] sm:$0xff] }
 0x475   :  { %v1135_v12 = vadd.f32 %v3008_v38, %v1097_v48  ;;  %v3050_v38 = vld [vmem:[%s3156_s1 + $0x48] sm:$0xff] }
 0x478   :  { %v1029_v26 = vpop.f32.mrf.mxu3 }
 0x479   :  { %v1030_v46 = vadd.f32 %v1029_v26, %v2980_v32 }
 0x47b   :  { %v1068_v3 = vadd.f32 %v1067_v44, %v1030_v46 }
 0x47d   :  { %v1106_v32 = vadd.f32 %v1105_v11, %v1068_v3 }
 0x47f   :  { %v1144_v14 = vadd.f32 %v1143_v22, %v1106_v32 }
 0x480   :  { %v1032_v6 = vpop.f32.mrf.mxu3 }
 0x481   :  { %v1033_v15 = vadd.f32 %v1032_v6, %v2982_v2  ;;  %v1065_v2 = vadd.f32 %v1064_v30, %v1027_v53  ;;  %v3078_v30 = vld [vmem:[%s3156_s1 + $0x68] sm:$0x3] }
 0x483   :  { %v1071_v37 = vadd.f32 %v1070_v16, %v1033_v15  ;;  %v1103_v24 = vadd.f32 %v1102_v40, %v1065_v2  ;;  %v1100_v16 = vadd.f32 %v1099_v43, %v1062_v10  ;;  %v3064_v43 = vld [vmem:[%s3156_s1 + $0x58] sm:$0xff]  ;;  %v1628_v15 = vld [vmem:[%s3155_s3] ss:$0 sm:$0xff] }
 0x485   :  { %v1109_v13 = vadd.f32 %v1108_v20, %v1071_v37  ;;  %v1141_v44 = vadd.f32 %v1140_v31, %v1103_v24  ;;  %v1138_v39 = vadd.f32 %v3012_v34, %v1100_v16  ;;  %v3071_v34 = vld [vmem:[%s3156_s1 + $0x60] sm:$0xff] }
 0x487   :  { %v1147_v26 = vadd.f32 %v1146_v4, %v1109_v13 }
 0x488   :  { %v1035_v47 = vpop.f32.mrf.mxu3 }
 0x489   :  { %v1036_v62 = vadd.f32 %v1035_v47, %v998_v61 }
 0x48b   :  { %v1074_v45 = vadd.f32 %v1073_v19, %v1036_v62 }
 0x48d   :  { %v1112_v21 = vadd.f32 %v1111_v63, %v1074_v45 }
 0x48f   :  { %v1150_v36 = vadd.f32 %v1149_v0, %v1112_v21 }
 0x490   :  { %v1038_v18 = vpop.f32.mrf.mxu3 }
 0x491   :  { %v1039_v50 = vadd.f32 %v1038_v18, %v1001_v41 }
 0x493   :  { %v1077_v28 = vadd.f32 %v1076_v58, %v1039_v50 }
 0x495   :  { %v1115_v25 = vadd.f32 %v1114_v54, %v1077_v28 }
 0x497   :  { %v1153_v60 = vadd.f32 %v1152_v52, %v1115_v25 }
 0x499   :  { %1552 = vmatpush.msk.msra.mxu3 %vm513_vm0, %v1153_v60 }
 0x49b   :  { %1189 = vmatpush.msra.mxu3 %v1150_v36 }
 0x49d   :  { %1190 = vmatpush.msra.mxu3 %v1147_v26 }
 0x49f   :  { %1191 = vmatpush.msra.mxu3 %v1144_v14 }
 0x4a1   :  { %1192 = vmatpush.msra.mxu3 %v1141_v44 }
 0x4a3   :  { %1193 = vmatpush.msra.mxu3 %v1138_v39 }
 0x4a5   :  { %1194 = vmatpush.msra.mxu3 %v1135_v12 }
 0x4a6   :  { %1553 = vmatmul.msk.f32.vlgmr.msra.gmra.mxu3 %vm491_vm1, %v3036_v49 }
 0x4ae   :  { %1554 = vmatmul.msk.f32.gmra.mxu3 %vm491_vm1, %v3043_v42 }
 0x4b6   :  { %1555 = vmatmul.msk.f32.gmra.mxu3 %vm491_vm1, %v3050_v38 }
 0x4be   :  { %1556 = vmatmul.msk.f32.gmra.mxu3 %vm491_vm1, %v3057_v9 }
 0x4c6   :  { %1557 = vmatmul.msk.f32.gmra.mxu3 %vm491_vm1, %v3064_v43 }
 0x4ce   :  { %1558 = vmatmul.msk.f32.gmra.mxu3 %vm491_vm1, %v3071_v34 }
 0x4d6   :  { %1559 = vmatmul.msk.f32.gmra.mxu3 %vm491_vm1, %v3078_v30 }
 0x529   :  { %v1196_v40 = vpop.f32.mrf.mxu3 }
 0x52a   :  { %v1197_v31 = vadd.f32 %v2543_v51, %v1196_v40 }
 0x52c   :  { %v1217_v11 = vmax.f32 %v1197_v31, 0.0 }
 0x52e   :  { %1560 = vmatmul.msk.f32.vlgmr.msrb.gmra.mxu0 %vm562_vm2, %v1217_v11 }
 0x531   :  { %v1199_v22 = vpop.f32.mrf.mxu3 }
 0x532   :  { %v1200_v20 = vadd.f32 %v2543_v51, %v1199_v22 }
 0x534   :  { %v1218_v6 = vmax.f32 %v1200_v20, 0.0 }
 0x536   :  { %1561 = vmatmul.msk.f32.gmra.mxu0 %vm562_vm2, %v1218_v6 }
 0x539   :  { %v1202_v4 = vpop.f32.mrf.mxu3 }
 0x53a   :  { %v1203_v19 = vadd.f32 %v2543_v51, %v1202_v4 }
 0x53c   :  { %v1219_v27 = vmax.f32 %v1203_v19, 0.0 }
 0x53e   :  { %1562 = vmatmul.msk.f32.gmra.mxu0 %vm562_vm2, %v1219_v27 }
 0x541   :  { %v1205_v47 = vpop.f32.mrf.mxu3 }
 0x542   :  { %v1206_v63 = vadd.f32 %v2543_v51, %v1205_v47 }
 0x544   :  { %v1220_v0 = vmax.f32 %v1206_v63, 0.0 }
 0x546   :  { %1563 = vmatmul.msk.f32.gmra.mxu0 %vm562_vm2, %v1220_v0 }
 0x549   :  { %v1208_v61 = vpop.f32.mrf.mxu3 }
 0x54a   :  { %v1209_v59 = vadd.f32 %v2543_v51, %v1208_v61 }
 0x54c   :  { %v1221_v62 = vmax.f32 %v1209_v59, 0.0 }
 0x54e   :  { %1564 = vmatmul.msk.f32.gmra.mxu0 %vm562_vm2, %v1221_v62 }
 0x551   :  { %v1211_v41 = vpop.f32.mrf.mxu3 }
 0x552   :  { %v1212_v18 = vadd.f32 %v1628_v15, %v1211_v41 }
 0x554   :  { %v1222_v58 = vmax.f32 %v1212_v18, 0.0 }
 0x556   :  { %1565 = vmatmul.msk.f32.gmra.mxu0 %vm562_vm2, %v1222_v58 }
 0x559   :  { %v1214_v46 = vpop.f32.mrf.mxu3 }
 0x55a   :  { %v1215_v45 = vadd.f32 %v1628_v15, %v1214_v46 }
 0x55c   :  { %v1223_v50 = vmax.f32 %v1215_v45, 0.0 }
 0x55e   :  { %1566 = vmatmul.msk.f32.gmra.mxu0 %vm562_vm2, %v1223_v50 }
 0x5ab   :  { %v1262_v54 = vpop.f32.mrf.mxu0 }
 0x5b3   :  { %v1265_v53 = vpop.f32.mrf.mxu0 }
 0x5bb   :  { %v1268_v51 = vpop.f32.mrf.mxu0 }
 0x5c3   :  { %v1271_v37 = vpop.f32.mrf.mxu0 }
 0x5cb   :  { %v1274_v28 = vpop.f32.mrf.mxu0 }
 0x5d3   :  { %v1277_v52 = vpop.f32.mrf.mxu0 }
 0x5db   :  { %v1280_v23 = vpop.f32.mrf.mxu0 }
 0x5dc   :  { %1567 = vmatpush.msk.msrb.mxu1 %vm513_vm0, %v1280_v23 }
 0x5de   :  { %1296 = vmatpush.msrb.mxu1 %v1277_v52 }
 0x5e0   :  { %1297 = vmatpush.msrb.mxu1 %v1274_v28 }
 0x5e2   :  { %1298 = vmatpush.msrb.mxu1 %v1271_v37 }
 0x5e4   :  { %1299 = vmatpush.msrb.mxu1 %v1268_v51 }
 0x5e6   :  { %1300 = vmatpush.msrb.mxu1 %v1265_v53 }
 0x5e8   :  { %1301 = vmatpush.msrb.mxu1 %v1262_v54 }
 0x5e9   :  { %1568 = vmatmul.msk.f32.vlgmr.msrb.gmra.mxu1 %vm491_vm1, %v3036_v49 }
 0x5f1   :  { %1569 = vmatmul.msk.f32.gmra.mxu1 %vm491_vm1, %v3043_v42 }
 0x5f9   :  { %1570 = vmatmul.msk.f32.gmra.mxu1 %vm491_vm1, %v3050_v38 }
 0x601   :  { %1571 = vmatmul.msk.f32.gmra.mxu1 %vm491_vm1, %v3057_v9 }
 0x609   :  { %1572 = vmatmul.msk.f32.gmra.mxu1 %vm491_vm1, %v3064_v43 }
 0x611   :  { %1573 = vmatmul.msk.f32.gmra.mxu1 %vm491_vm1, %v3071_v34 }
 0x619   :  { %1574 = vmatmul.msk.f32.gmra.mxu1 %vm491_vm1, %v3078_v30 }
 0x666   :  { %v1303_v3 = vpop.f32.mrf.mxu1 }
 0x667   :  { %v1304_v21 = vadd.f32 %v2695_v35, %v1303_v3 }
 0x669   :  { %v1324_v25 = vmax.f32 %v1304_v21, 0.0 }
 0x66b   :  { %1575 = vmatmul.msk.f32.vlgmr.msrb.gmra.mxu2 %vm673_vm3, %v1324_v25 }
 0x66e   :  { %v1306_v33 = vpop.f32.mrf.mxu1 }
 0x66f   :  { %v1307_v2 = vadd.f32 %v2695_v35, %v1306_v33 }
 0x671   :  { %v1325_v13 = vmax.f32 %v1307_v2, 0.0 }
 0x673   :  { %1576 = vmatmul.msk.f32.gmra.mxu2 %vm673_vm3, %v1325_v13 }
 0x676   :  { %v1309_v60 = vpop.f32.mrf.mxu1 }
 0x677   :  { %v1310_v10 = vadd.f32 %v2695_v35, %v1309_v60 }
 0x679   :  { %v1326_v32 = vmax.f32 %v1310_v10, 0.0 }
 0x67b   :  { %1577 = vmatmul.msk.f32.gmra.mxu2 %vm673_vm3, %v1326_v32 }
 0x67e   :  { %v1312_v36 = vpop.f32.mrf.mxu1 }
 0x67f   :  { %v1313_v56 = vadd.f32 %v2695_v35, %v1312_v36 }
 0x681   :  { %v1327_v24 = vmax.f32 %v1313_v56, 0.0 }
 0x683   :  { %1578 = vmatmul.msk.f32.gmra.mxu2 %vm673_vm3, %v1327_v24 }
 0x686   :  { %v1315_v26 = vpop.f32.mrf.mxu1 }
 0x687   :  { %v1316_v16 = vadd.f32 %v2695_v35, %v1315_v26 }
 0x689   :  { %v1328_v14 = vmax.f32 %v1316_v16, 0.0 }
 0x68b   :  { %1579 = vmatmul.msk.f32.gmra.mxu2 %vm673_vm3, %v1328_v14 }
 0x68e   :  { %v1318_v48 = vpop.f32.mrf.mxu1 }
 0x68f   :  { %v1319_v44 = vadd.f32 %v2695_v35, %v1318_v48 }
 0x691   :  { %v1329_v39 = vmax.f32 %v1319_v44, 0.0 }
 0x693   :  { %1580 = vmatmul.msk.f32.gmra.mxu2 %vm673_vm3, %v1329_v39 }
 0x696   :  { %v1321_v12 = vpop.f32.mrf.mxu1 }
 0x697   :  { %v1322_v40 = vadd.f32 %v2695_v35, %v1321_v12 }
 0x699   :  { %v1330_v31 = vmax.f32 %v1322_v40, 0.0 }
 0x69b   :  { %1581 = vmatmul.msk.f32.gmra.mxu2 %vm673_vm3, %v1330_v31 }
 0x6ee   :  { %v1369_v11 = vpop.f32.mrf.mxu2 }
 0x6f6   :  { %v1372_v22 = vpop.f32.mrf.mxu2 }
 0x6fe   :  { %v1375_v20 = vpop.f32.mrf.mxu2 }
 0x706   :  { %v1378_v6 = vpop.f32.mrf.mxu2 }
 0x70e   :  { %v1381_v4 = vpop.f32.mrf.mxu2 }
 0x716   :  { %v1384_v19 = vpop.f32.mrf.mxu2 }
 0x71e   :  { %v1387_v27 = vpop.f32.mrf.mxu2 }
 0x71f   :  { %1582 = vmatpush.msk.msrb.mxu3 %vm513_vm0, %v1387_v27 }
 0x721   :  { %1403 = vmatpush.msrb.mxu3 %v1384_v19 }
 0x723   :  { %1404 = vmatpush.msrb.mxu3 %v1381_v4 }
 0x725   :  { %1405 = vmatpush.msrb.mxu3 %v1378_v6 }
 0x727   :  { %1406 = vmatpush.msrb.mxu3 %v1375_v20 }
 0x729   :  { %1407 = vmatpush.msrb.mxu3 %v1372_v22 }
 0x72b   :  { %1408 = vmatpush.msrb.mxu3 %v1369_v11 }
 0x72c   :  { %1583 = vmatmul.msk.f32.vlgmr.msrb.gmra.mxu3 %vm491_vm1, %v3036_v49 }
 0x734   :  { %1584 = vmatmul.msk.f32.gmra.mxu3 %vm491_vm1, %v3043_v42 }
 0x73c   :  { %1585 = vmatmul.msk.f32.gmra.mxu3 %vm491_vm1, %v3050_v38 }
 0x744   :  { %1586 = vmatmul.msk.f32.gmra.mxu3 %vm491_vm1, %v3057_v9 }
 0x74c   :  { %1587 = vmatmul.msk.f32.gmra.mxu3 %vm491_vm1, %v3064_v43 }
 0x754   :  { %1588 = vmatmul.msk.f32.gmra.mxu3 %vm491_vm1, %v3071_v34 }
 0x75c   :  { %1589 = vmatmul.msk.f32.gmra.mxu3 %vm491_vm1, %v3078_v30 }
 0x7af   :  { %v1410_v35 = vpop.f32.mrf.mxu3 }
 0x7b0   :  { %v1431_v38 = vmul.f32 %v1410_v35, %v2984_v1 }
 0x7b7   :  { %v1413_v49 = vpop.f32.mrf.mxu3 }
 0x7b8   :  { %v1432_v0 = vmul.f32 %v1413_v49, %v2990_v17 }
 0x7ba   :  { %v1438_v59 = vadd.f32 %v1432_v0, %v1431_v38 }
 0x7bf   :  { %v1416_v47 = vpop.f32.mrf.mxu3 }
 0x7c0   :  { %v1433_v9 = vmul.f32 %v1416_v47, %v2986_v55 }
 0x7c2   :  { %v1439_v62 = vadd.f32 %v1438_v59, %v1433_v9 }
 0x7c7   :  { %v1419_v63 = vpop.f32.mrf.mxu3 }
 0x7c8   :  { %v1434_v43 = vmul.f32 %v1419_v63, %v2993_v29 }
 0x7ca   :  { %v1440_v41 = vadd.f32 %v1439_v62, %v1434_v43 }
 0x7cf   :  { %v1422_v42 = vpop.f32.mrf.mxu3 }
 0x7d0   :  { %v1435_v34 = vmul.f32 %v1422_v42, %v2988_v5 }
 0x7d2   :  { %v1441_v15 = vadd.f32 %v1440_v41, %v1435_v34 }
 0x7d7   :  { %v1425_v61 = vpop.f32.mrf.mxu3 }
 0x7d8   :  { %v1436_v30 = vmul.f32 %v1425_v61, %v2998_v8 }
 0x7da   :  { %v1442_v46 = vadd.f32 %v1441_v15, %v1436_v30 }
 0x7df   :  { %v1428_v18 = vpop.f32.mrf.mxu3 }
 0x7e0   :  { %v1437_v58 = vmul.f32 %v1428_v18, %v3004_v57 }
 0x7e2   :  { %v1443_v17 = vsel %vm513_vm0, %v1437_v58, 0.0 }
 0x7e3   :  { %v1444_v1 = vadd.f32 %v1443_v17, %v1442_v46 }
 0x7e5   :  { %v1445_v45 = vrot.slane %v1444_v1, 4 }
 0x7e7   :  { %v1446_v55 = vadd.f32 %v1445_v45, %v1444_v1 }
 0x7e9   :  { %v1447_v50 = vrot.slane %v1446_v55, 2 }
 0x7eb   :  { %v1448_v54 = vadd.f32 %v1447_v50, %v1446_v55 }
 0x7ed   :  { %v1449_v53 = vrot.slane %v1448_v54, 1 }
 0x7ef   :  { %v1450_v29 = vadd.f32 %v1449_v53, %v1448_v54 }
 0x7f1   :  { %v1451_v51 = vadd.f32 %v1450_v29, %v3017_v7 }
 0x7f3   :  { %1590 = vst [vmem:[%s3162_s9 + $0x1] sm:$0x1] %v1451_v51 }

</bundles_post_ra>
